<compile_context>
chip_gen: v7x
topology: tpu7x:2x2x1
jax: 0.10.0
libtpu: 0.0.40
codegen_flags: <defaults>
</compile_context>

<pallas_src>
import functools

import jax
import jax.numpy as jnp
import numpy as np
from jax.experimental import pallas as pl
from jax.experimental.pallas import tpu as pltpu


_UNROLL_MAX = 32  # max fully-unrolled timesteps per grid step


def _auto_time_chunk(T, B, cap):
    """Largest divisor of T that is <= cap and keeps chunk rows 8-sublane aligned."""
    if T <= cap:
        return T
    for tc in range(cap, 0, -1):
        if T % tc == 0 and (tc * B) % 8 == 0:
            return tc
    return T  # rare: no aligned divisor under the cap -> fall back to whole-T unroll


def _lstm_chunk_kernel(x_ref, h0_ref, we_ref, be_ref, wih_ref, whh_ref, b_ref,
                       wo_ref, bo_ref, out_ref, state_ref, htop_ref, *,
                       hidden_size, n_layers, batch, chunk, gate_dtype):
    """Processes `chunk` consecutive timesteps. Grid axis 0 = time-chunk (MUST stay sequential)."""
    H, L, B, TC = hidden_size, n_layers, batch, chunk

    # Initialise the carried (h, c) state from the learned initial hidden on the first chunk only.
    @pl.when(pl.program_id(0) == 0)
    def _init():
        state_ref[...] = h0_ref[...]

    # Embed every timestep of the chunk with ONE matmul: (TC*B, Din) @ (Din, H).
    emb = jnp.dot(x_ref[...], we_ref[...], preferred_element_type=jnp.float32) + be_ref[...]

    # Hoist per-layer weights and (broadcast) biases out of the timestep loop: loaded once per chunk.
    wih = [wih_ref[l].astype(gate_dtype) for l in range(L)]            # (H, 4H) each
    whh = [whh_ref[l].astype(gate_dtype) for l in range(L)]            # (H, 4H) each
    bia = [jnp.broadcast_to(b_ref[l], (B, 4 * H)) for l in range(L)]   # combined b_ih + b_hh

    # Carried state (state2var layout: [h_l, c_l] per layer) -> per-layer (h, c) locals.
    st = state_ref[...]
    hs = [st[:, 2 * H * l:      2 * H * l + H] for l in range(L)]
    cs = [st[:, 2 * H * l + H:  2 * H * (l + 1)] for l in range(L)]

    # Static unroll over the chunk's timesteps (chunk is capped at UNROLL_MAX by the wrapper).
    for t in range(TC):
        h_in = emb[t * B:(t + 1) * B, :]                               # (B, H), static slice
        for l in range(L):
            # Fused-free gate pre-activation: two MXU pushes, no lane concat on the critical chain.
            z = (jnp.dot(h_in.astype(gate_dtype), wih[l], preferred_element_type=jnp.float32)
                 + jnp.dot(hs[l].astype(gate_dtype), whh[l], preferred_element_type=jnp.float32)
                 + bia[l])                                             # (B, 4H)
            # PyTorch nn.LSTMCell gate order: input, forget, cell(g), output.
            sg = jax.nn.sigmoid(z)                                     # full-width: 1 EUP pass at B<8
            g = jnp.tanh(z[:, 2 * H:3 * H])                            # tanh only on the g slice
            c_new = sg[:, H:2 * H] * cs[l] + sg[:, 0:H] * g
            h_new = sg[:, 3 * H:4 * H] * jnp.tanh(c_new)
            hs[l], cs[l] = h_new, c_new
            h_in = h_new
        # Stage the top-layer h of this step into the chunk-wide scratch (static-offset store).
        htop_ref[t * B:(t + 1) * B, :] = h_in

    # Single lane-dense store of the carried state (B, 2*H*L) for the next chunk.
    state_ref[...] = jnp.concatenate([v for l in range(L) for v in (hs[l], cs[l])], axis=1)

    # Output Linear for the whole chunk with ONE matmul: (TC*B, H) @ (H, Dout).
    out_ref[...] = (jnp.dot(htop_ref[...], wo_ref[...], preferred_element_type=jnp.float32)
                    + bo_ref[...]).astype(out_ref.dtype)


def base_processing_lstm_time_major(x_tm, params, *, hidden_size, n_layers,
                                    time_chunk=None, unroll_max=_UNROLL_MAX,
                                    gate_dtype=jnp.float32):
    """Core entry point. x_tm: (T, B, in_dim) f32 (time-major). Returns (T, B, out_dim)."""
    T, B, Din = x_tm.shape
    H, L = hidden_size, n_layers
    Dout = params["wo"].shape[1]
    HL2 = 2 * H * L

    TC = _auto_time_chunk(T, B, unroll_max) if time_chunk is None else time_chunk
    assert T % TC == 0, "time_chunk must divide T"
    rows = TC * B
    n_chunks = T // TC
    assert (rows % 8 == 0) or (n_chunks == 1), "chunk rows must be a multiple of 8 (sublane tile)"

    # Contiguous (T, B, Din) -> (T*B, Din) merge: no transpose, each timestep is B contiguous rows.
    x2 = x_tm.reshape(T * B, Din)
    # initial_hidden is a (1, 2HL) parameter repeated over the batch (repeat_interleave in PyTorch).
    h0 = jnp.broadcast_to(params["h0"].astype(jnp.float32), (B, HL2))

    kernel = functools.partial(_lstm_chunk_kernel, hidden_size=H, n_layers=L,
                               batch=B, chunk=TC, gate_dtype=gate_dtype)

    full = lambda a: pl.BlockSpec(a.shape, lambda c: (0,) * a.ndim)  # weight resident in VMEM

    out2 = pl.pallas_call(
        kernel,
        out_shape=jax.ShapeDtypeStruct((T * B, Dout), jnp.float32),
        grid=(n_chunks,),
        in_specs=[
            pl.BlockSpec((rows, Din), lambda c: (c, 0)),   # x chunk (time-major rows)
            full(h0),                                      # initial hidden (B, 2HL)
            full(params["we"]), full(params["be"]),        # embed Linear
            full(params["wih"]), full(params["whh"]),      # per-layer LSTM weights (kept separate)
            full(params["b"]),                             # combined per-layer bias (b_ih + b_hh)
            full(params["wo"]), full(params["bo"]),        # output Linear
        ],
        out_specs=pl.BlockSpec((rows, Dout), lambda c: (c, 0)),
        scratch_shapes=[
            pltpu.VMEM((B, HL2), jnp.float32),             # (h, c) state carried across chunks
            pltpu.VMEM((rows, H), jnp.float32),            # per-step top-layer h staging
        ],
        compiler_params=pltpu.CompilerParams(
            # True recurrence over time: this axis MUST remain sequential ("arbitrary").
            # Do NOT mark it "parallel" (e.g. for megacore) — the state carry would silently break.
            dimension_semantics=("arbitrary",)),
    )(x2, h0, params["we"], params["be"], params["wih"], params["whh"],
      params["b"], params["wo"], params["bo"])

    return out2.reshape(T, B, Dout)


def base_processing_lstm(x, params, **kwargs):
    """(B, T, in_dim) convenience API matching BaseProcessingLSTM.forward. Returns (B, T, out_dim).

    The swapaxes here are the only wrapper-side transposes; production callers with large B*T
    should use `base_processing_lstm_time_major` directly to avoid the extra HBM round-trips.
    """
    out_tm = base_processing_lstm_time_major(jnp.swapaxes(x, 0, 1), params, **kwargs)
    return jnp.swapaxes(out_tm, 0, 1)


def _reference(x, params, *, hidden_size, n_layers):
    """Pure-JAX reference with the module's recurrent semantics (sanity check)."""
    H, L = hidden_size, n_layers
    B, T, _ = x.shape
    h0 = jnp.broadcast_to(params["h0"], (B, 2 * H * L))
    h = [h0[:, 2 * H * l: 2 * H * l + H] for l in range(L)]
    c = [h0[:, 2 * H * l + H: 2 * H * (l + 1)] for l in range(L)]
    outs = []
    for t in range(T):
        h_in = x[:, t] @ params["we"] + params["be"]
        for l in range(L):
            gates = h_in @ params["wih"][l] + h[l] @ params["whh"][l] + params["b"][l]
            i_g = jax.nn.sigmoid(gates[:, 0:H])
            f_g = jax.nn.sigmoid(gates[:, H:2 * H])
            g_g = jnp.tanh(gates[:, 2 * H:3 * H])
            o_g = jax.nn.sigmoid(gates[:, 3 * H:4 * H])
            c[l] = f_g * c[l] + i_g * g_g
            h[l] = o_g * jnp.tanh(c[l])
            h_in = h[l]
        outs.append(h_in @ params["wo"] + params["bo"])
    return jnp.stack(outs, axis=1)


if __name__ == "__main__":
    # hp: nz_mid_lstm=32, n_lstm_layers=2, use_conv_lstm=False, batch_size=2
    B, Din, Dout, H, L = 2, 4, 4, 32, 2

    key = jax.random.PRNGKey(0)
    ks = jax.random.split(key, 12)
    s = 1.0 / np.sqrt(H)
    u = lambda k, shape: jax.random.uniform(k, shape, jnp.float32, -s, s)

    # nn.Linear embed: weight (H, Din) stored transposed; bias (H,)
    we = u(ks[0], (Din, H))
    be = u(ks[1], (1, H))
    # nn.LSTMCell per layer: weight_ih / weight_hh (4H, H) stored transposed; biases (4H,)
    wih = u(ks[2], (L, H, 4 * H))
    whh = u(ks[3], (L, H, 4 * H))
    # CustomLSTMCell.init_bias: forget-gate segment [H:2H] of each bias filled with 1.0
    b_ih = u(ks[4], (L, 4 * H)).at[:, H:2 * H].set(1.0)
    b_hh = u(ks[5], (L, 4 * H)).at[:, H:2 * H].set(1.0)
    b = (b_ih + b_hh)[:, None, :]                          # (L, 1, 4H) combined bias
    # nn.Linear output
    wo = u(ks[6], (H, Dout))
    bo = u(ks[7], (1, Dout))
    # Learned initial hidden parameter (zeros at init in PyTorch; random here to exercise the carry).
    h0 = u(ks[9], (1, 2 * H * L))

    params = {"we": we, "be": be, "wih": wih, "whh": whh, "b": b, "wo": wo, "bo": bo, "h0": h0}

    # Test 1: T=8 -> default chunk = T, grid=(1,), single fully-unrolled chunk (no grid overhead).
    x = jax.random.normal(ks[8], (B, 8, Din), jnp.float32)
    out = jax.block_until_ready(base_processing_lstm(x, params, hidden_size=H, n_layers=L))
    ref = _reference(x, params, hidden_size=H, n_layers=L)
    np.testing.assert_allclose(np.asarray(out), np.asarray(ref), rtol=2e-4, atol=2e-4)
    assert out.shape == (B, 8, Dout)

    # Test 2: T=64 -> auto chunk = 32 (unroll cap), grid=(2,): exercises the sequential (h, c)
    # state carry across grid steps and the capped unroll.
    x2 = jax.random.normal(ks[10], (B, 64, Din), jnp.float32)
    out2 = jax.block_until_ready(base_processing_lstm(x2, params, hidden_size=H, n_layers=L))
    ref2 = _reference(x2, params, hidden_size=H, n_layers=L)
    np.testing.assert_allclose(np.asarray(out2), np.asarray(ref2), rtol=1e-3, atol=1e-3)
    assert out2.shape == (B, 64, Dout)

    print("KERNEL_OK")
</pallas_src>

<mosaic_0001>
module attributes {stable_mosaic.version = 11 : i64} {
  func.func @_lstm_chunk_kernel(%arg0: i32, %arg1: memref<16x4xf32, #tpu.memory_space<vmem>>, %arg2: memref<2x128xf32, #tpu.memory_space<vmem>>, %arg3: memref<4x32xf32, #tpu.memory_space<vmem>>, %arg4: memref<1x32xf32, #tpu.memory_space<vmem>>, %arg5: memref<2x32x128xf32, #tpu.memory_space<vmem>>, %arg6: memref<2x32x128xf32, #tpu.memory_space<vmem>>, %arg7: memref<2x1x128xf32, #tpu.memory_space<vmem>>, %arg8: memref<32x4xf32, #tpu.memory_space<vmem>>, %arg9: memref<1x4xf32, #tpu.memory_space<vmem>>, %arg10: memref<16x4xf32, #tpu.memory_space<vmem>>, %arg11: memref<2x128xf32, #tpu.memory_space<vmem>>, %arg12: memref<16x32xf32, #tpu.memory_space<vmem>>) attributes {dimension_semantics = [#tpu.dimension_semantics<arbitrary>], iteration_bounds = array<i64: 1>, scalar_prefetch = 0 : i64, scratch_operands = 2 : i64, tpu.core_type = #tpu.core_type<tc>, window_params = [{transform_indices = @transform_0, window_bounds = array<i64: 16, 4>}, {pipeline_mode = #tpu.pipeline_mode<synchronous>, transform_indices = @transform_1, window_bounds = array<i64: 2, 128>}, {pipeline_mode = #tpu.pipeline_mode<synchronous>, transform_indices = @transform_2, window_bounds = array<i64: 4, 32>}, {pipeline_mode = #tpu.pipeline_mode<synchronous>, transform_indices = @transform_3, window_bounds = array<i64: 1, 32>}, {pipeline_mode = #tpu.pipeline_mode<synchronous>, transform_indices = @transform_4, window_bounds = array<i64: 2, 32, 128>}, {pipeline_mode = #tpu.pipeline_mode<synchronous>, transform_indices = @transform_5, window_bounds = array<i64: 2, 32, 128>}, {pipeline_mode = #tpu.pipeline_mode<synchronous>, transform_indices = @transform_6, window_bounds = array<i64: 2, 1, 128>}, {pipeline_mode = #tpu.pipeline_mode<synchronous>, transform_indices = @transform_7, window_bounds = array<i64: 32, 4>}, {pipeline_mode = #tpu.pipeline_mode<synchronous>, transform_indices = @transform_8, window_bounds = array<i64: 1, 4>}, {transform_indices = @transform_9, window_bounds = array<i64: 16, 4>}]} {
    %c0_i32 = arith.constant 0 : i32
    %0 = arith.cmpi eq, %arg0, %c0_i32 : i32
    %1 = arith.extui %0 : i1 to i32
    %c0_i32_0 = arith.constant 0 : i32
    %2 = arith.cmpi ne, %1, %c0_i32_0 : i32
    scf.if %2 {
      %c0_93 = arith.constant 0 : index
      %c0_94 = arith.constant 0 : index
      %359 = vector.load %arg2[%c0_93, %c0_94] : memref<2x128xf32, #tpu.memory_space<vmem>>, vector<2x128xf32>
      %c0_95 = arith.constant 0 : index
      %c0_96 = arith.constant 0 : index
      %360 = vector.load %arg11[%c0_95, %c0_96] : memref<2x128xf32, #tpu.memory_space<vmem>>, vector<2x128xf32>
      tpu.vector_store %arg11[%c0_95, %c0_96], %359 {strides = array<i32>} : memref<2x128xf32, #tpu.memory_space<vmem>>, vector<2x128xf32>,
    } else {
    }
    %c0 = arith.constant 0 : index
    %c0_1 = arith.constant 0 : index
    %3 = vector.load %arg1[%c0, %c0_1] : memref<16x4xf32, #tpu.memory_space<vmem>>, vector<16x4xf32>
    %c0_2 = arith.constant 0 : index
    %c0_3 = arith.constant 0 : index
    %4 = vector.load %arg3[%c0_2, %c0_3] : memref<4x32xf32, #tpu.memory_space<vmem>>, vector<4x32xf32>
    %cst = arith.constant dense<0.000000e+00> : vector<16x32xf32>
    %5 = tpu.matmul %3, %4, %cst {dimension_numbers = #tpu.dot_dimension_numbers<[1], [0], [0], [1], [0, 0, 1, 1], [], []>} : vector<16x4xf32>, vector<4x32xf32>, vector<16x32xf32> -> vector<16x32xf32>
    %c0_4 = arith.constant 0 : index
    %c0_5 = arith.constant 0 : index
    %6 = vector.load %arg4[%c0_4, %c0_5] : memref<1x32xf32, #tpu.memory_space<vmem>>, vector<1x32xf32>
    %7 = vector.broadcast %6 : vector<1x32xf32> to vector<16x32xf32>
    %8 = arith.addf %5, %7 : vector<16x32xf32>
    %c0_6 = arith.constant 0 : index
    %c0_7 = arith.constant 0 : index
    %c0_8 = arith.constant 0 : index
    %9 = vector.load %arg5[%c0_6, %c0_7, %c0_8] : memref<2x32x128xf32, #tpu.memory_space<vmem>>, vector<1x32x128xf32>
    %10 = vector.shape_cast %9 : vector<1x32x128xf32> to vector<32x128xf32>
    %c1 = arith.constant 1 : index
    %c0_9 = arith.constant 0 : index
    %c0_10 = arith.constant 0 : index
    %11 = vector.load %arg5[%c1, %c0_9, %c0_10] : memref<2x32x128xf32, #tpu.memory_space<vmem>>, vector<1x32x128xf32>
    %12 = vector.shape_cast %11 : vector<1x32x128xf32> to vector<32x128xf32>
    %c0_11 = arith.constant 0 : index
    %c0_12 = arith.constant 0 : index
    %c0_13 = arith.constant 0 : index
    %13 = vector.load %arg6[%c0_11, %c0_12, %c0_13] : memref<2x32x128xf32, #tpu.memory_space<vmem>>, vector<1x32x128xf32>
    %14 = vector.shape_cast %13 : vector<1x32x128xf32> to vector<32x128xf32>
    %c1_14 = arith.constant 1 : index
    %c0_15 = arith.constant 0 : index
    %c0_16 = arith.constant 0 : index
    %15 = vector.load %arg6[%c1_14, %c0_15, %c0_16] : memref<2x32x128xf32, #tpu.memory_space<vmem>>, vector<1x32x128xf32>
    %16 = vector.shape_cast %15 : vector<1x32x128xf32> to vector<32x128xf32>
    %c0_17 = arith.constant 0 : index
    %c0_18 = arith.constant 0 : index
    %c0_19 = arith.constant 0 : index
    %17 = vector.load %arg7[%c0_17, %c0_18, %c0_19] : memref<2x1x128xf32, #tpu.memory_space<vmem>>, vector<1x1x128xf32>
    %18 = vector.shape_cast %17 : vector<1x1x128xf32> to vector<1x128xf32>
    %19 = vector.shape_cast %18 : vector<1x128xf32> to vector<1x128xf32>
    %20 = vector.broadcast %19 : vector<1x128xf32> to vector<2x128xf32>
    %c1_20 = arith.constant 1 : index
    %c0_21 = arith.constant 0 : index
    %c0_22 = arith.constant 0 : index
    %21 = vector.load %arg7[%c1_20, %c0_21, %c0_22] : memref<2x1x128xf32, #tpu.memory_space<vmem>>, vector<1x1x128xf32>
    %22 = vector.shape_cast %21 : vector<1x1x128xf32> to vector<1x128xf32>
    %23 = vector.shape_cast %22 : vector<1x128xf32> to vector<1x128xf32>
    %24 = vector.broadcast %23 : vector<1x128xf32> to vector<2x128xf32>
    %c0_23 = arith.constant 0 : index
    %c0_24 = arith.constant 0 : index
    %25 = vector.load %arg11[%c0_23, %c0_24] : memref<2x128xf32, #tpu.memory_space<vmem>>, vector<2x128xf32>
    %26 = vector.extract_strided_slice %25 {offsets = [0, 0], sizes = [2, 32], strides = [1, 1]} : vector<2x128xf32> to vector<2x32xf32>
    %27 = vector.extract_strided_slice %25 {offsets = [0, 64], sizes = [2, 32], strides = [1, 1]} : vector<2x128xf32> to vector<2x32xf32>
    %28 = vector.extract_strided_slice %25 {offsets = [0, 32], sizes = [2, 32], strides = [1, 1]} : vector<2x128xf32> to vector<2x32xf32>
    %29 = vector.extract_strided_slice %25 {offsets = [0, 96], sizes = [2, 32], strides = [1, 1]} : vector<2x128xf32> to vector<2x32xf32>
    %30 = vector.extract_strided_slice %8 {offsets = [0, 0], sizes = [2, 32], strides = [1, 1]} : vector<16x32xf32> to vector<2x32xf32>
    %cst_25 = arith.constant dense<0.000000e+00> : vector<2x128xf32>
    %31 = tpu.matmul %30, %10, %cst_25 {dimension_numbers = #tpu.dot_dimension_numbers<[1], [0], [0], [1], [0, 0, 1, 1], [], []>} : vector<2x32xf32>, vector<32x128xf32>, vector<2x128xf32> -> vector<2x128xf32>
    %cst_26 = arith.constant dense<0.000000e+00> : vector<2x128xf32>
    %32 = tpu.matmul %26, %14, %cst_26 {dimension_numbers = #tpu.dot_dimension_numbers<[1], [0], [0], [1], [0, 0, 1, 1], [], []>} : vector<2x32xf32>, vector<32x128xf32>, vector<2x128xf32> -> vector<2x128xf32>
    %33 = arith.addf %31, %32 : vector<2x128xf32>
    %34 = arith.addf %33, %20 : vector<2x128xf32>
    %35 = arith.negf %34 : vector<2x128xf32>
    %36 = math.exp %35 : vector<2x128xf32>
    %cst_27 = arith.constant 1.000000e+00 : f32
    %37 = vector.broadcast %cst_27 : f32 to vector<2x128xf32>
    %38 = arith.addf %37, %36 : vector<2x128xf32>
    %39 = arith.divf %37, %38 : vector<2x128xf32>
    %40 = vector.extract_strided_slice %34 {offsets = [0, 64], sizes = [2, 32], strides = [1, 1]} : vector<2x128xf32> to vector<2x32xf32>
    %41 = math.tanh %40 : vector<2x32xf32>
    %42 = vector.extract_strided_slice %39 {offsets = [0, 32], sizes = [2, 32], strides = [1, 1]} : vector<2x128xf32> to vector<2x32xf32>
    %43 = arith.mulf %42, %28 : vector<2x32xf32>
    %44 = vector.extract_strided_slice %39 {offsets = [0, 0], sizes = [2, 32], strides = [1, 1]} : vector<2x128xf32> to vector<2x32xf32>
    %45 = arith.mulf %44, %41 : vector<2x32xf32>
    %46 = arith.addf %43, %45 : vector<2x32xf32>
    %47 = vector.extract_strided_slice %39 {offsets = [0, 96], sizes = [2, 32], strides = [1, 1]} : vector<2x128xf32> to vector<2x32xf32>
    %48 = math.tanh %46 : vector<2x32xf32>
    %49 = arith.mulf %47, %48 : vector<2x32xf32>
    %cst_28 = arith.constant dense<0.000000e+00> : vector<2x128xf32>
    %50 = tpu.matmul %49, %12, %cst_28 {dimension_numbers = #tpu.dot_dimension_numbers<[1], [0], [0], [1], [0, 0, 1, 1], [], []>} : vector<2x32xf32>, vector<32x128xf32>, vector<2x128xf32> -> vector<2x128xf32>
    %cst_29 = arith.constant dense<0.000000e+00> : vector<2x128xf32>
    %51 = tpu.matmul %27, %16, %cst_29 {dimension_numbers = #tpu.dot_dimension_numbers<[1], [0], [0], [1], [0, 0, 1, 1], [], []>} : vector<2x32xf32>, vector<32x128xf32>, vector<2x128xf32> -> vector<2x128xf32>
    %52 = arith.addf %50, %51 : vector<2x128xf32>
    %53 = arith.addf %52, %24 : vector<2x128xf32>
    %54 = arith.negf %53 : vector<2x128xf32>
    %55 = math.exp %54 : vector<2x128xf32>
    %cst_30 = arith.constant 1.000000e+00 : f32
    %56 = vector.broadcast %cst_30 : f32 to vector<2x128xf32>
    %57 = arith.addf %56, %55 : vector<2x128xf32>
    %58 = arith.divf %56, %57 : vector<2x128xf32>
    %59 = vector.extract_strided_slice %53 {offsets = [0, 64], sizes = [2, 32], strides = [1, 1]} : vector<2x128xf32> to vector<2x32xf32>
    %60 = math.tanh %59 : vector<2x32xf32>
    %61 = vector.extract_strided_slice %58 {offsets = [0, 32], sizes = [2, 32], strides = [1, 1]} : vector<2x128xf32> to vector<2x32xf32>
    %62 = arith.mulf %61, %29 : vector<2x32xf32>
    %63 = vector.extract_strided_slice %58 {offsets = [0, 0], sizes = [2, 32], strides = [1, 1]} : vector<2x128xf32> to vector<2x32xf32>
    %64 = arith.mulf %63, %60 : vector<2x32xf32>
    %65 = arith.addf %62, %64 : vector<2x32xf32>
    %66 = vector.extract_strided_slice %58 {offsets = [0, 96], sizes = [2, 32], strides = [1, 1]} : vector<2x128xf32> to vector<2x32xf32>
    %67 = math.tanh %65 : vector<2x32xf32>
    %68 = arith.mulf %66, %67 : vector<2x32xf32>
    %c0_31 = arith.constant 0 : index
    %c0_32 = arith.constant 0 : index
    %69 = vector.load %arg12[%c0_31, %c0_32] : memref<16x32xf32, #tpu.memory_space<vmem>>, vector<2x32xf32>
    tpu.vector_store %arg12[%c0_31, %c0_32], %68 {strides = array<i32>} : memref<16x32xf32, #tpu.memory_space<vmem>>, vector<2x32xf32>,
    %70 = vector.extract_strided_slice %8 {offsets = [2, 0], sizes = [2, 32], strides = [1, 1]} : vector<16x32xf32> to vector<2x32xf32>
    %cst_33 = arith.constant dense<0.000000e+00> : vector<2x128xf32>
    %71 = tpu.matmul %70, %10, %cst_33 {dimension_numbers = #tpu.dot_dimension_numbers<[1], [0], [0], [1], [0, 0, 1, 1], [], []>} : vector<2x32xf32>, vector<32x128xf32>, vector<2x128xf32> -> vector<2x128xf32>
    %cst_34 = arith.constant dense<0.000000e+00> : vector<2x128xf32>
    %72 = tpu.matmul %49, %14, %cst_34 {dimension_numbers = #tpu.dot_dimension_numbers<[1], [0], [0], [1], [0, 0, 1, 1], [], []>} : vector<2x32xf32>, vector<32x128xf32>, vector<2x128xf32> -> vector<2x128xf32>
    %73 = arith.addf %71, %72 : vector<2x128xf32>
    %74 = arith.addf %73, %20 : vector<2x128xf32>
    %75 = arith.negf %74 : vector<2x128xf32>
    %76 = math.exp %75 : vector<2x128xf32>
    %cst_35 = arith.constant 1.000000e+00 : f32
    %77 = vector.broadcast %cst_35 : f32 to vector<2x128xf32>
    %78 = arith.addf %77, %76 : vector<2x128xf32>
    %79 = arith.divf %77, %78 : vector<2x128xf32>
    %80 = vector.extract_strided_slice %74 {offsets = [0, 64], sizes = [2, 32], strides = [1, 1]} : vector<2x128xf32> to vector<2x32xf32>
    %81 = math.tanh %80 : vector<2x32xf32>
    %82 = vector.extract_strided_slice %79 {offsets = [0, 32], sizes = [2, 32], strides = [1, 1]} : vector<2x128xf32> to vector<2x32xf32>
    %83 = arith.mulf %82, %46 : vector<2x32xf32>
    %84 = vector.extract_strided_slice %79 {offsets = [0, 0], sizes = [2, 32], strides = [1, 1]} : vector<2x128xf32> to vector<2x32xf32>
    %85 = arith.mulf %84, %81 : vector<2x32xf32>
    %86 = arith.addf %83, %85 : vector<2x32xf32>
    %87 = vector.extract_strided_slice %79 {offsets = [0, 96], sizes = [2, 32], strides = [1, 1]} : vector<2x128xf32> to vector<2x32xf32>
    %88 = math.tanh %86 : vector<2x32xf32>
    %89 = arith.mulf %87, %88 : vector<2x32xf32>
    %cst_36 = arith.constant dense<0.000000e+00> : vector<2x128xf32>
    %90 = tpu.matmul %89, %12, %cst_36 {dimension_numbers = #tpu.dot_dimension_numbers<[1], [0], [0], [1], [0, 0, 1, 1], [], []>} : vector<2x32xf32>, vector<32x128xf32>, vector<2x128xf32> -> vector<2x128xf32>
    %cst_37 = arith.constant dense<0.000000e+00> : vector<2x128xf32>
    %91 = tpu.matmul %68, %16, %cst_37 {dimension_numbers = #tpu.dot_dimension_numbers<[1], [0], [0], [1], [0, 0, 1, 1], [], []>} : vector<2x32xf32>, vector<32x128xf32>, vector<2x128xf32> -> vector<2x128xf32>
    %92 = arith.addf %90, %91 : vector<2x128xf32>
    %93 = arith.addf %92, %24 : vector<2x128xf32>
    %94 = arith.negf %93 : vector<2x128xf32>
    %95 = math.exp %94 : vector<2x128xf32>
    %cst_38 = arith.constant 1.000000e+00 : f32
    %96 = vector.broadcast %cst_38 : f32 to vector<2x128xf32>
    %97 = arith.addf %96, %95 : vector<2x128xf32>
    %98 = arith.divf %96, %97 : vector<2x128xf32>
    %99 = vector.extract_strided_slice %93 {offsets = [0, 64], sizes = [2, 32], strides = [1, 1]} : vector<2x128xf32> to vector<2x32xf32>
    %100 = math.tanh %99 : vector<2x32xf32>
    %101 = vector.extract_strided_slice %98 {offsets = [0, 32], sizes = [2, 32], strides = [1, 1]} : vector<2x128xf32> to vector<2x32xf32>
    %102 = arith.mulf %101, %65 : vector<2x32xf32>
    %103 = vector.extract_strided_slice %98 {offsets = [0, 0], sizes = [2, 32], strides = [1, 1]} : vector<2x128xf32> to vector<2x32xf32>
    %104 = arith.mulf %103, %100 : vector<2x32xf32>
    %105 = arith.addf %102, %104 : vector<2x32xf32>
    %106 = vector.extract_strided_slice %98 {offsets = [0, 96], sizes = [2, 32], strides = [1, 1]} : vector<2x128xf32> to vector<2x32xf32>
    %107 = math.tanh %105 : vector<2x32xf32>
    %108 = arith.mulf %106, %107 : vector<2x32xf32>
    %c2 = arith.constant 2 : index
    %c0_39 = arith.constant 0 : index
    %109 = vector.load %arg12[%c2, %c0_39] : memref<16x32xf32, #tpu.memory_space<vmem>>, vector<2x32xf32>
    tpu.vector_store %arg12[%c2, %c0_39], %108 {strides = array<i32>} : memref<16x32xf32, #tpu.memory_space<vmem>>, vector<2x32xf32>,
    %110 = vector.extract_strided_slice %8 {offsets = [4, 0], sizes = [2, 32], strides = [1, 1]} : vector<16x32xf32> to vector<2x32xf32>
    %cst_40 = arith.constant dense<0.000000e+00> : vector<2x128xf32>
    %111 = tpu.matmul %110, %10, %cst_40 {dimension_numbers = #tpu.dot_dimension_numbers<[1], [0], [0], [1], [0, 0, 1, 1], [], []>} : vector<2x32xf32>, vector<32x128xf32>, vector<2x128xf32> -> vector<2x128xf32>
    %cst_41 = arith.constant dense<0.000000e+00> : vector<2x128xf32>
    %112 = tpu.matmul %89, %14, %cst_41 {dimension_numbers = #tpu.dot_dimension_numbers<[1], [0], [0], [1], [0, 0, 1, 1], [], []>} : vector<2x32xf32>, vector<32x128xf32>, vector<2x128xf32> -> vector<2x128xf32>
    %113 = arith.addf %111, %112 : vector<2x128xf32>
    %114 = arith.addf %113, %20 : vector<2x128xf32>
    %115 = arith.negf %114 : vector<2x128xf32>
    %116 = math.exp %115 : vector<2x128xf32>
    %cst_42 = arith.constant 1.000000e+00 : f32
    %117 = vector.broadcast %cst_42 : f32 to vector<2x128xf32>
    %118 = arith.addf %117, %116 : vector<2x128xf32>
    %119 = arith.divf %117, %118 : vector<2x128xf32>
    %120 = vector.extract_strided_slice %114 {offsets = [0, 64], sizes = [2, 32], strides = [1, 1]} : vector<2x128xf32> to vector<2x32xf32>
    %121 = math.tanh %120 : vector<2x32xf32>
    %122 = vector.extract_strided_slice %119 {offsets = [0, 32], sizes = [2, 32], strides = [1, 1]} : vector<2x128xf32> to vector<2x32xf32>
    %123 = arith.mulf %122, %86 : vector<2x32xf32>
    %124 = vector.extract_strided_slice %119 {offsets = [0, 0], sizes = [2, 32], strides = [1, 1]} : vector<2x128xf32> to vector<2x32xf32>
    %125 = arith.mulf %124, %121 : vector<2x32xf32>
    %126 = arith.addf %123, %125 : vector<2x32xf32>
    %127 = vector.extract_strided_slice %119 {offsets = [0, 96], sizes = [2, 32], strides = [1, 1]} : vector<2x128xf32> to vector<2x32xf32>
    %128 = math.tanh %126 : vector<2x32xf32>
    %129 = arith.mulf %127, %128 : vector<2x32xf32>
    %cst_43 = arith.constant dense<0.000000e+00> : vector<2x128xf32>
    %130 = tpu.matmul %129, %12, %cst_43 {dimension_numbers = #tpu.dot_dimension_numbers<[1], [0], [0], [1], [0, 0, 1, 1], [], []>} : vector<2x32xf32>, vector<32x128xf32>, vector<2x128xf32> -> vector<2x128xf32>
    %cst_44 = arith.constant dense<0.000000e+00> : vector<2x128xf32>
    %131 = tpu.matmul %108, %16, %cst_44 {dimension_numbers = #tpu.dot_dimension_numbers<[1], [0], [0], [1], [0, 0, 1, 1], [], []>} : vector<2x32xf32>, vector<32x128xf32>, vector<2x128xf32> -> vector<2x128xf32>
    %132 = arith.addf %130, %131 : vector<2x128xf32>
    %133 = arith.addf %132, %24 : vector<2x128xf32>
    %134 = arith.negf %133 : vector<2x128xf32>
    %135 = math.exp %134 : vector<2x128xf32>
    %cst_45 = arith.constant 1.000000e+00 : f32
    %136 = vector.broadcast %cst_45 : f32 to vector<2x128xf32>
    %137 = arith.addf %136, %135 : vector<2x128xf32>
    %138 = arith.divf %136, %137 : vector<2x128xf32>
    %139 = vector.extract_strided_slice %133 {offsets = [0, 64], sizes = [2, 32], strides = [1, 1]} : vector<2x128xf32> to vector<2x32xf32>
    %140 = math.tanh %139 : vector<2x32xf32>
    %141 = vector.extract_strided_slice %138 {offsets = [0, 32], sizes = [2, 32], strides = [1, 1]} : vector<2x128xf32> to vector<2x32xf32>
    %142 = arith.mulf %141, %105 : vector<2x32xf32>
    %143 = vector.extract_strided_slice %138 {offsets = [0, 0], sizes = [2, 32], strides = [1, 1]} : vector<2x128xf32> to vector<2x32xf32>
    %144 = arith.mulf %143, %140 : vector<2x32xf32>
    %145 = arith.addf %142, %144 : vector<2x32xf32>
    %146 = vector.extract_strided_slice %138 {offsets = [0, 96], sizes = [2, 32], strides = [1, 1]} : vector<2x128xf32> to vector<2x32xf32>
    %147 = math.tanh %145 : vector<2x32xf32>
    %148 = arith.mulf %146, %147 : vector<2x32xf32>
    %c4 = arith.constant 4 : index
    %c0_46 = arith.constant 0 : index
    %149 = vector.load %arg12[%c4, %c0_46] : memref<16x32xf32, #tpu.memory_space<vmem>>, vector<2x32xf32>
    tpu.vector_store %arg12[%c4, %c0_46], %148 {strides = array<i32>} : memref<16x32xf32, #tpu.memory_space<vmem>>, vector<2x32xf32>,
    %150 = vector.extract_strided_slice %8 {offsets = [6, 0], sizes = [2, 32], strides = [1, 1]} : vector<16x32xf32> to vector<2x32xf32>
    %cst_47 = arith.constant dense<0.000000e+00> : vector<2x128xf32>
    %151 = tpu.matmul %150, %10, %cst_47 {dimension_numbers = #tpu.dot_dimension_numbers<[1], [0], [0], [1], [0, 0, 1, 1], [], []>} : vector<2x32xf32>, vector<32x128xf32>, vector<2x128xf32> -> vector<2x128xf32>
    %cst_48 = arith.constant dense<0.000000e+00> : vector<2x128xf32>
    %152 = tpu.matmul %129, %14, %cst_48 {dimension_numbers = #tpu.dot_dimension_numbers<[1], [0], [0], [1], [0, 0, 1, 1], [], []>} : vector<2x32xf32>, vector<32x128xf32>, vector<2x128xf32> -> vector<2x128xf32>
    %153 = arith.addf %151, %152 : vector<2x128xf32>
    %154 = arith.addf %153, %20 : vector<2x128xf32>
    %155 = arith.negf %154 : vector<2x128xf32>
    %156 = math.exp %155 : vector<2x128xf32>
    %cst_49 = arith.constant 1.000000e+00 : f32
    %157 = vector.broadcast %cst_49 : f32 to vector<2x128xf32>
    %158 = arith.addf %157, %156 : vector<2x128xf32>
    %159 = arith.divf %157, %158 : vector<2x128xf32>
    %160 = vector.extract_strided_slice %154 {offsets = [0, 64], sizes = [2, 32], strides = [1, 1]} : vector<2x128xf32> to vector<2x32xf32>
    %161 = math.tanh %160 : vector<2x32xf32>
    %162 = vector.extract_strided_slice %159 {offsets = [0, 32], sizes = [2, 32], strides = [1, 1]} : vector<2x128xf32> to vector<2x32xf32>
    %163 = arith.mulf %162, %126 : vector<2x32xf32>
    %164 = vector.extract_strided_slice %159 {offsets = [0, 0], sizes = [2, 32], strides = [1, 1]} : vector<2x128xf32> to vector<2x32xf32>
    %165 = arith.mulf %164, %161 : vector<2x32xf32>
    %166 = arith.addf %163, %165 : vector<2x32xf32>
    %167 = vector.extract_strided_slice %159 {offsets = [0, 96], sizes = [2, 32], strides = [1, 1]} : vector<2x128xf32> to vector<2x32xf32>
    %168 = math.tanh %166 : vector<2x32xf32>
    %169 = arith.mulf %167, %168 : vector<2x32xf32>
    %cst_50 = arith.constant dense<0.000000e+00> : vector<2x128xf32>
    %170 = tpu.matmul %169, %12, %cst_50 {dimension_numbers = #tpu.dot_dimension_numbers<[1], [0], [0], [1], [0, 0, 1, 1], [], []>} : vector<2x32xf32>, vector<32x128xf32>, vector<2x128xf32> -> vector<2x128xf32>
    %cst_51 = arith.constant dense<0.000000e+00> : vector<2x128xf32>
    %171 = tpu.matmul %148, %16, %cst_51 {dimension_numbers = #tpu.dot_dimension_numbers<[1], [0], [0], [1], [0, 0, 1, 1], [], []>} : vector<2x32xf32>, vector<32x128xf32>, vector<2x128xf32> -> vector<2x128xf32>
    %172 = arith.addf %170, %171 : vector<2x128xf32>
    %173 = arith.addf %172, %24 : vector<2x128xf32>
    %174 = arith.negf %173 : vector<2x128xf32>
    %175 = math.exp %174 : vector<2x128xf32>
    %cst_52 = arith.constant 1.000000e+00 : f32
    %176 = vector.broadcast %cst_52 : f32 to vector<2x128xf32>
    %177 = arith.addf %176, %175 : vector<2x128xf32>
    %178 = arith.divf %176, %177 : vector<2x128xf32>
    %179 = vector.extract_strided_slice %173 {offsets = [0, 64], sizes = [2, 32], strides = [1, 1]} : vector<2x128xf32> to vector<2x32xf32>
    %180 = math.tanh %179 : vector<2x32xf32>
    %181 = vector.extract_strided_slice %178 {offsets = [0, 32], sizes = [2, 32], strides = [1, 1]} : vector<2x128xf32> to vector<2x32xf32>
    %182 = arith.mulf %181, %145 : vector<2x32xf32>
    %183 = vector.extract_strided_slice %178 {offsets = [0, 0], sizes = [2, 32], strides = [1, 1]} : vector<2x128xf32> to vector<2x32xf32>
    %184 = arith.mulf %183, %180 : vector<2x32xf32>
    %185 = arith.addf %182, %184 : vector<2x32xf32>
    %186 = vector.extract_strided_slice %178 {offsets = [0, 96], sizes = [2, 32], strides = [1, 1]} : vector<2x128xf32> to vector<2x32xf32>
    %187 = math.tanh %185 : vector<2x32xf32>
    %188 = arith.mulf %186, %187 : vector<2x32xf32>
    %c6 = arith.constant 6 : index
    %c0_53 = arith.constant 0 : index
    %189 = vector.load %arg12[%c6, %c0_53] : memref<16x32xf32, #tpu.memory_space<vmem>>, vector<2x32xf32>
    tpu.vector_store %arg12[%c6, %c0_53], %188 {strides = array<i32>} : memref<16x32xf32, #tpu.memory_space<vmem>>, vector<2x32xf32>,
    %190 = vector.extract_strided_slice %8 {offsets = [8, 0], sizes = [2, 32], strides = [1, 1]} : vector<16x32xf32> to vector<2x32xf32>
    %cst_54 = arith.constant dense<0.000000e+00> : vector<2x128xf32>
    %191 = tpu.matmul %190, %10, %cst_54 {dimension_numbers = #tpu.dot_dimension_numbers<[1], [0], [0], [1], [0, 0, 1, 1], [], []>} : vector<2x32xf32>, vector<32x128xf32>, vector<2x128xf32> -> vector<2x128xf32>
    %cst_55 = arith.constant dense<0.000000e+00> : vector<2x128xf32>
    %192 = tpu.matmul %169, %14, %cst_55 {dimension_numbers = #tpu.dot_dimension_numbers<[1], [0], [0], [1], [0, 0, 1, 1], [], []>} : vector<2x32xf32>, vector<32x128xf32>, vector<2x128xf32> -> vector<2x128xf32>
    %193 = arith.addf %191, %192 : vector<2x128xf32>
    %194 = arith.addf %193, %20 : vector<2x128xf32>
    %195 = arith.negf %194 : vector<2x128xf32>
    %196 = math.exp %195 : vector<2x128xf32>
    %cst_56 = arith.constant 1.000000e+00 : f32
    %197 = vector.broadcast %cst_56 : f32 to vector<2x128xf32>
    %198 = arith.addf %197, %196 : vector<2x128xf32>
    %199 = arith.divf %197, %198 : vector<2x128xf32>
    %200 = vector.extract_strided_slice %194 {offsets = [0, 64], sizes = [2, 32], strides = [1, 1]} : vector<2x128xf32> to vector<2x32xf32>
    %201 = math.tanh %200 : vector<2x32xf32>
    %202 = vector.extract_strided_slice %199 {offsets = [0, 32], sizes = [2, 32], strides = [1, 1]} : vector<2x128xf32> to vector<2x32xf32>
    %203 = arith.mulf %202, %166 : vector<2x32xf32>
    %204 = vector.extract_strided_slice %199 {offsets = [0, 0], sizes = [2, 32], strides = [1, 1]} : vector<2x128xf32> to vector<2x32xf32>
    %205 = arith.mulf %204, %201 : vector<2x32xf32>
    %206 = arith.addf %203, %205 : vector<2x32xf32>
    %207 = vector.extract_strided_slice %199 {offsets = [0, 96], sizes = [2, 32], strides = [1, 1]} : vector<2x128xf32> to vector<2x32xf32>
    %208 = math.tanh %206 : vector<2x32xf32>
    %209 = arith.mulf %207, %208 : vector<2x32xf32>
    %cst_57 = arith.constant dense<0.000000e+00> : vector<2x128xf32>
    %210 = tpu.matmul %209, %12, %cst_57 {dimension_numbers = #tpu.dot_dimension_numbers<[1], [0], [0], [1], [0, 0, 1, 1], [], []>} : vector<2x32xf32>, vector<32x128xf32>, vector<2x128xf32> -> vector<2x128xf32>
    %cst_58 = arith.constant dense<0.000000e+00> : vector<2x128xf32>
    %211 = tpu.matmul %188, %16, %cst_58 {dimension_numbers = #tpu.dot_dimension_numbers<[1], [0], [0], [1], [0, 0, 1, 1], [], []>} : vector<2x32xf32>, vector<32x128xf32>, vector<2x128xf32> -> vector<2x128xf32>
    %212 = arith.addf %210, %211 : vector<2x128xf32>
    %213 = arith.addf %212, %24 : vector<2x128xf32>
    %214 = arith.negf %213 : vector<2x128xf32>
    %215 = math.exp %214 : vector<2x128xf32>
    %cst_59 = arith.constant 1.000000e+00 : f32
    %216 = vector.broadcast %cst_59 : f32 to vector<2x128xf32>
    %217 = arith.addf %216, %215 : vector<2x128xf32>
    %218 = arith.divf %216, %217 : vector<2x128xf32>
    %219 = vector.extract_strided_slice %213 {offsets = [0, 64], sizes = [2, 32], strides = [1, 1]} : vector<2x128xf32> to vector<2x32xf32>
    %220 = math.tanh %219 : vector<2x32xf32>
    %221 = vector.extract_strided_slice %218 {offsets = [0, 32], sizes = [2, 32], strides = [1, 1]} : vector<2x128xf32> to vector<2x32xf32>
    %222 = arith.mulf %221, %185 : vector<2x32xf32>
    %223 = vector.extract_strided_slice %218 {offsets = [0, 0], sizes = [2, 32], strides = [1, 1]} : vector<2x128xf32> to vector<2x32xf32>
    %224 = arith.mulf %223, %220 : vector<2x32xf32>
    %225 = arith.addf %222, %224 : vector<2x32xf32>
    %226 = vector.extract_strided_slice %218 {offsets = [0, 96], sizes = [2, 32], strides = [1, 1]} : vector<2x128xf32> to vector<2x32xf32>
    %227 = math.tanh %225 : vector<2x32xf32>
    %228 = arith.mulf %226, %227 : vector<2x32xf32>
    %c8 = arith.constant 8 : index
    %c0_60 = arith.constant 0 : index
    %229 = vector.load %arg12[%c8, %c0_60] : memref<16x32xf32, #tpu.memory_space<vmem>>, vector<2x32xf32>
    tpu.vector_store %arg12[%c8, %c0_60], %228 {strides = array<i32>} : memref<16x32xf32, #tpu.memory_space<vmem>>, vector<2x32xf32>,
    %230 = vector.extract_strided_slice %8 {offsets = [10, 0], sizes = [2, 32], strides = [1, 1]} : vector<16x32xf32> to vector<2x32xf32>
    %cst_61 = arith.constant dense<0.000000e+00> : vector<2x128xf32>
    %231 = tpu.matmul %230, %10, %cst_61 {dimension_numbers = #tpu.dot_dimension_numbers<[1], [0], [0], [1], [0, 0, 1, 1], [], []>} : vector<2x32xf32>, vector<32x128xf32>, vector<2x128xf32> -> vector<2x128xf32>
    %cst_62 = arith.constant dense<0.000000e+00> : vector<2x128xf32>
    %232 = tpu.matmul %209, %14, %cst_62 {dimension_numbers = #tpu.dot_dimension_numbers<[1], [0], [0], [1], [0, 0, 1, 1], [], []>} : vector<2x32xf32>, vector<32x128xf32>, vector<2x128xf32> -> vector<2x128xf32>
    %233 = arith.addf %231, %232 : vector<2x128xf32>
    %234 = arith.addf %233, %20 : vector<2x128xf32>
    %235 = arith.negf %234 : vector<2x128xf32>
    %236 = math.exp %235 : vector<2x128xf32>
    %cst_63 = arith.constant 1.000000e+00 : f32
    %237 = vector.broadcast %cst_63 : f32 to vector<2x128xf32>
    %238 = arith.addf %237, %236 : vector<2x128xf32>
    %239 = arith.divf %237, %238 : vector<2x128xf32>
    %240 = vector.extract_strided_slice %234 {offsets = [0, 64], sizes = [2, 32], strides = [1, 1]} : vector<2x128xf32> to vector<2x32xf32>
    %241 = math.tanh %240 : vector<2x32xf32>
    %242 = vector.extract_strided_slice %239 {offsets = [0, 32], sizes = [2, 32], strides = [1, 1]} : vector<2x128xf32> to vector<2x32xf32>
    %243 = arith.mulf %242, %206 : vector<2x32xf32>
    %244 = vector.extract_strided_slice %239 {offsets = [0, 0], sizes = [2, 32], strides = [1, 1]} : vector<2x128xf32> to vector<2x32xf32>
    %245 = arith.mulf %244, %241 : vector<2x32xf32>
    %246 = arith.addf %243, %245 : vector<2x32xf32>
    %247 = vector.extract_strided_slice %239 {offsets = [0, 96], sizes = [2, 32], strides = [1, 1]} : vector<2x128xf32> to vector<2x32xf32>
    %248 = math.tanh %246 : vector<2x32xf32>
    %249 = arith.mulf %247, %248 : vector<2x32xf32>
    %cst_64 = arith.constant dense<0.000000e+00> : vector<2x128xf32>
    %250 = tpu.matmul %249, %12, %cst_64 {dimension_numbers = #tpu.dot_dimension_numbers<[1], [0], [0], [1], [0, 0, 1, 1], [], []>} : vector<2x32xf32>, vector<32x128xf32>, vector<2x128xf32> -> vector<2x128xf32>
    %cst_65 = arith.constant dense<0.000000e+00> : vector<2x128xf32>
    %251 = tpu.matmul %228, %16, %cst_65 {dimension_numbers = #tpu.dot_dimension_numbers<[1], [0], [0], [1], [0, 0, 1, 1], [], []>} : vector<2x32xf32>, vector<32x128xf32>, vector<2x128xf32> -> vector<2x128xf32>
    %252 = arith.addf %250, %251 : vector<2x128xf32>
    %253 = arith.addf %252, %24 : vector<2x128xf32>
    %254 = arith.negf %253 : vector<2x128xf32>
    %255 = math.exp %254 : vector<2x128xf32>
    %cst_66 = arith.constant 1.000000e+00 : f32
    %256 = vector.broadcast %cst_66 : f32 to vector<2x128xf32>
    %257 = arith.addf %256, %255 : vector<2x128xf32>
    %258 = arith.divf %256, %257 : vector<2x128xf32>
    %259 = vector.extract_strided_slice %253 {offsets = [0, 64], sizes = [2, 32], strides = [1, 1]} : vector<2x128xf32> to vector<2x32xf32>
    %260 = math.tanh %259 : vector<2x32xf32>
    %261 = vector.extract_strided_slice %258 {offsets = [0, 32], sizes = [2, 32], strides = [1, 1]} : vector<2x128xf32> to vector<2x32xf32>
    %262 = arith.mulf %261, %225 : vector<2x32xf32>
    %263 = vector.extract_strided_slice %258 {offsets = [0, 0], sizes = [2, 32], strides = [1, 1]} : vector<2x128xf32> to vector<2x32xf32>
    %264 = arith.mulf %263, %260 : vector<2x32xf32>
    %265 = arith.addf %262, %264 : vector<2x32xf32>
    %266 = vector.extract_strided_slice %258 {offsets = [0, 96], sizes = [2, 32], strides = [1, 1]} : vector<2x128xf32> to vector<2x32xf32>
    %267 = math.tanh %265 : vector<2x32xf32>
    %268 = arith.mulf %266, %267 : vector<2x32xf32>
    %c10 = arith.constant 10 : index
    %c0_67 = arith.constant 0 : index
    %269 = vector.load %arg12[%c10, %c0_67] : memref<16x32xf32, #tpu.memory_space<vmem>>, vector<2x32xf32>
    tpu.vector_store %arg12[%c10, %c0_67], %268 {strides = array<i32>} : memref<16x32xf32, #tpu.memory_space<vmem>>, vector<2x32xf32>,
    %270 = vector.extract_strided_slice %8 {offsets = [12, 0], sizes = [2, 32], strides = [1, 1]} : vector<16x32xf32> to vector<2x32xf32>
    %cst_68 = arith.constant dense<0.000000e+00> : vector<2x128xf32>
    %271 = tpu.matmul %270, %10, %cst_68 {dimension_numbers = #tpu.dot_dimension_numbers<[1], [0], [0], [1], [0, 0, 1, 1], [], []>} : vector<2x32xf32>, vector<32x128xf32>, vector<2x128xf32> -> vector<2x128xf32>
    %cst_69 = arith.constant dense<0.000000e+00> : vector<2x128xf32>
    %272 = tpu.matmul %249, %14, %cst_69 {dimension_numbers = #tpu.dot_dimension_numbers<[1], [0], [0], [1], [0, 0, 1, 1], [], []>} : vector<2x32xf32>, vector<32x128xf32>, vector<2x128xf32> -> vector<2x128xf32>
    %273 = arith.addf %271, %272 : vector<2x128xf32>
    %274 = arith.addf %273, %20 : vector<2x128xf32>
    %275 = arith.negf %274 : vector<2x128xf32>
    %276 = math.exp %275 : vector<2x128xf32>
    %cst_70 = arith.constant 1.000000e+00 : f32
    %277 = vector.broadcast %cst_70 : f32 to vector<2x128xf32>
    %278 = arith.addf %277, %276 : vector<2x128xf32>
    %279 = arith.divf %277, %278 : vector<2x128xf32>
    %280 = vector.extract_strided_slice %274 {offsets = [0, 64], sizes = [2, 32], strides = [1, 1]} : vector<2x128xf32> to vector<2x32xf32>
    %281 = math.tanh %280 : vector<2x32xf32>
    %282 = vector.extract_strided_slice %279 {offsets = [0, 32], sizes = [2, 32], strides = [1, 1]} : vector<2x128xf32> to vector<2x32xf32>
    %283 = arith.mulf %282, %246 : vector<2x32xf32>
    %284 = vector.extract_strided_slice %279 {offsets = [0, 0], sizes = [2, 32], strides = [1, 1]} : vector<2x128xf32> to vector<2x32xf32>
    %285 = arith.mulf %284, %281 : vector<2x32xf32>
    %286 = arith.addf %283, %285 : vector<2x32xf32>
    %287 = vector.extract_strided_slice %279 {offsets = [0, 96], sizes = [2, 32], strides = [1, 1]} : vector<2x128xf32> to vector<2x32xf32>
    %288 = math.tanh %286 : vector<2x32xf32>
    %289 = arith.mulf %287, %288 : vector<2x32xf32>
    %cst_71 = arith.constant dense<0.000000e+00> : vector<2x128xf32>
    %290 = tpu.matmul %289, %12, %cst_71 {dimension_numbers = #tpu.dot_dimension_numbers<[1], [0], [0], [1], [0, 0, 1, 1], [], []>} : vector<2x32xf32>, vector<32x128xf32>, vector<2x128xf32> -> vector<2x128xf32>
    %cst_72 = arith.constant dense<0.000000e+00> : vector<2x128xf32>
    %291 = tpu.matmul %268, %16, %cst_72 {dimension_numbers = #tpu.dot_dimension_numbers<[1], [0], [0], [1], [0, 0, 1, 1], [], []>} : vector<2x32xf32>, vector<32x128xf32>, vector<2x128xf32> -> vector<2x128xf32>
    %292 = arith.addf %290, %291 : vector<2x128xf32>
    %293 = arith.addf %292, %24 : vector<2x128xf32>
    %294 = arith.negf %293 : vector<2x128xf32>
    %295 = math.exp %294 : vector<2x128xf32>
    %cst_73 = arith.constant 1.000000e+00 : f32
    %296 = vector.broadcast %cst_73 : f32 to vector<2x128xf32>
    %297 = arith.addf %296, %295 : vector<2x128xf32>
    %298 = arith.divf %296, %297 : vector<2x128xf32>
    %299 = vector.extract_strided_slice %293 {offsets = [0, 64], sizes = [2, 32], strides = [1, 1]} : vector<2x128xf32> to vector<2x32xf32>
    %300 = math.tanh %299 : vector<2x32xf32>
    %301 = vector.extract_strided_slice %298 {offsets = [0, 32], sizes = [2, 32], strides = [1, 1]} : vector<2x128xf32> to vector<2x32xf32>
    %302 = arith.mulf %301, %265 : vector<2x32xf32>
    %303 = vector.extract_strided_slice %298 {offsets = [0, 0], sizes = [2, 32], strides = [1, 1]} : vector<2x128xf32> to vector<2x32xf32>
    %304 = arith.mulf %303, %300 : vector<2x32xf32>
    %305 = arith.addf %302, %304 : vector<2x32xf32>
    %306 = vector.extract_strided_slice %298 {offsets = [0, 96], sizes = [2, 32], strides = [1, 1]} : vector<2x128xf32> to vector<2x32xf32>
    %307 = math.tanh %305 : vector<2x32xf32>
    %308 = arith.mulf %306, %307 : vector<2x32xf32>
    %c12 = arith.constant 12 : index
    %c0_74 = arith.constant 0 : index
    %309 = vector.load %arg12[%c12, %c0_74] : memref<16x32xf32, #tpu.memory_space<vmem>>, vector<2x32xf32>
    tpu.vector_store %arg12[%c12, %c0_74], %308 {strides = array<i32>} : memref<16x32xf32, #tpu.memory_space<vmem>>, vector<2x32xf32>,
    %310 = vector.extract_strided_slice %8 {offsets = [14, 0], sizes = [2, 32], strides = [1, 1]} : vector<16x32xf32> to vector<2x32xf32>
    %cst_75 = arith.constant dense<0.000000e+00> : vector<2x128xf32>
    %311 = tpu.matmul %310, %10, %cst_75 {dimension_numbers = #tpu.dot_dimension_numbers<[1], [0], [0], [1], [0, 0, 1, 1], [], []>} : vector<2x32xf32>, vector<32x128xf32>, vector<2x128xf32> -> vector<2x128xf32>
    %cst_76 = arith.constant dense<0.000000e+00> : vector<2x128xf32>
    %312 = tpu.matmul %289, %14, %cst_76 {dimension_numbers = #tpu.dot_dimension_numbers<[1], [0], [0], [1], [0, 0, 1, 1], [], []>} : vector<2x32xf32>, vector<32x128xf32>, vector<2x128xf32> -> vector<2x128xf32>
    %313 = arith.addf %311, %312 : vector<2x128xf32>
    %314 = arith.addf %313, %20 : vector<2x128xf32>
    %315 = arith.negf %314 : vector<2x128xf32>
    %316 = math.exp %315 : vector<2x128xf32>
    %cst_77 = arith.constant 1.000000e+00 : f32
    %317 = vector.broadcast %cst_77 : f32 to vector<2x128xf32>
    %318 = arith.addf %317, %316 : vector<2x128xf32>
    %319 = arith.divf %317, %318 : vector<2x128xf32>
    %320 = vector.extract_strided_slice %314 {offsets = [0, 64], sizes = [2, 32], strides = [1, 1]} : vector<2x128xf32> to vector<2x32xf32>
    %321 = math.tanh %320 : vector<2x32xf32>
    %322 = vector.extract_strided_slice %319 {offsets = [0, 32], sizes = [2, 32], strides = [1, 1]} : vector<2x128xf32> to vector<2x32xf32>
    %323 = arith.mulf %322, %286 : vector<2x32xf32>
    %324 = vector.extract_strided_slice %319 {offsets = [0, 0], sizes = [2, 32], strides = [1, 1]} : vector<2x128xf32> to vector<2x32xf32>
    %325 = arith.mulf %324, %321 : vector<2x32xf32>
    %326 = arith.addf %323, %325 : vector<2x32xf32>
    %327 = vector.extract_strided_slice %319 {offsets = [0, 96], sizes = [2, 32], strides = [1, 1]} : vector<2x128xf32> to vector<2x32xf32>
    %328 = math.tanh %326 : vector<2x32xf32>
    %329 = arith.mulf %327, %328 : vector<2x32xf32>
    %cst_78 = arith.constant dense<0.000000e+00> : vector<2x128xf32>
    %330 = tpu.matmul %329, %12, %cst_78 {dimension_numbers = #tpu.dot_dimension_numbers<[1], [0], [0], [1], [0, 0, 1, 1], [], []>} : vector<2x32xf32>, vector<32x128xf32>, vector<2x128xf32> -> vector<2x128xf32>
    %cst_79 = arith.constant dense<0.000000e+00> : vector<2x128xf32>
    %331 = tpu.matmul %308, %16, %cst_79 {dimension_numbers = #tpu.dot_dimension_numbers<[1], [0], [0], [1], [0, 0, 1, 1], [], []>} : vector<2x32xf32>, vector<32x128xf32>, vector<2x128xf32> -> vector<2x128xf32>
    %332 = arith.addf %330, %331 : vector<2x128xf32>
    %333 = arith.addf %332, %24 : vector<2x128xf32>
    %334 = arith.negf %333 : vector<2x128xf32>
    %335 = math.exp %334 : vector<2x128xf32>
    %cst_80 = arith.constant 1.000000e+00 : f32
    %336 = vector.broadcast %cst_80 : f32 to vector<2x128xf32>
    %337 = arith.addf %336, %335 : vector<2x128xf32>
    %338 = arith.divf %336, %337 : vector<2x128xf32>
    %339 = vector.extract_strided_slice %333 {offsets = [0, 64], sizes = [2, 32], strides = [1, 1]} : vector<2x128xf32> to vector<2x32xf32>
    %340 = math.tanh %339 : vector<2x32xf32>
    %341 = vector.extract_strided_slice %338 {offsets = [0, 32], sizes = [2, 32], strides = [1, 1]} : vector<2x128xf32> to vector<2x32xf32>
    %342 = arith.mulf %341, %305 : vector<2x32xf32>
    %343 = vector.extract_strided_slice %338 {offsets = [0, 0], sizes = [2, 32], strides = [1, 1]} : vector<2x128xf32> to vector<2x32xf32>
    %344 = arith.mulf %343, %340 : vector<2x32xf32>
    %345 = arith.addf %342, %344 : vector<2x32xf32>
    %346 = vector.extract_strided_slice %338 {offsets = [0, 96], sizes = [2, 32], strides = [1, 1]} : vector<2x128xf32> to vector<2x32xf32>
    %347 = math.tanh %345 : vector<2x32xf32>
    %348 = arith.mulf %346, %347 : vector<2x32xf32>
    %c14 = arith.constant 14 : index
    %c0_81 = arith.constant 0 : index
    %349 = vector.load %arg12[%c14, %c0_81] : memref<16x32xf32, #tpu.memory_space<vmem>>, vector<2x32xf32>
    tpu.vector_store %arg12[%c14, %c0_81], %348 {strides = array<i32>} : memref<16x32xf32, #tpu.memory_space<vmem>>, vector<2x32xf32>,
    %350 = tpu.concatenate %329, %326, %348, %345 in 1 : vector<2x32xf32>, vector<2x32xf32>, vector<2x32xf32>, vector<2x32xf32> -> vector<2x128xf32>
    %c0_82 = arith.constant 0 : index
    %c0_83 = arith.constant 0 : index
    %351 = vector.load %arg11[%c0_82, %c0_83] : memref<2x128xf32, #tpu.memory_space<vmem>>, vector<2x128xf32>
    tpu.vector_store %arg11[%c0_82, %c0_83], %350 {strides = array<i32>} : memref<2x128xf32, #tpu.memory_space<vmem>>, vector<2x128xf32>,
    %c0_84 = arith.constant 0 : index
    %c0_85 = arith.constant 0 : index
    %352 = vector.load %arg12[%c0_84, %c0_85] : memref<16x32xf32, #tpu.memory_space<vmem>>, vector<16x32xf32>
    %c0_86 = arith.constant 0 : index
    %c0_87 = arith.constant 0 : index
    %353 = vector.load %arg8[%c0_86, %c0_87] : memref<32x4xf32, #tpu.memory_space<vmem>>, vector<32x4xf32>
    %cst_88 = arith.constant dense<0.000000e+00> : vector<16x4xf32>
    %354 = tpu.matmul %352, %353, %cst_88 {dimension_numbers = #tpu.dot_dimension_numbers<[1], [0], [0], [1], [0, 0, 1, 1], [], []>} : vector<16x32xf32>, vector<32x4xf32>, vector<16x4xf32> -> vector<16x4xf32>
    %c0_89 = arith.constant 0 : index
    %c0_90 = arith.constant 0 : index
    %355 = vector.load %arg9[%c0_89, %c0_90] : memref<1x4xf32, #tpu.memory_space<vmem>>, vector<1x4xf32>
    %356 = vector.broadcast %355 : vector<1x4xf32> to vector<16x4xf32>
    %357 = arith.addf %354, %356 : vector<16x4xf32>
    %c0_91 = arith.constant 0 : index
    %c0_92 = arith.constant 0 : index
    %358 = vector.load %arg10[%c0_91, %c0_92] : memref<16x4xf32, #tpu.memory_space<vmem>>, vector<16x4xf32>
    tpu.vector_store %arg10[%c0_91, %c0_92], %357 {strides = array<i32>} : memref<16x4xf32, #tpu.memory_space<vmem>>, vector<16x4xf32>,
    return
  }
  func.func @transform_0(%arg0: i32) -> (i32, i32) {
    %c0_i32 = arith.constant 0 : i32
    %c0_i32_0 = arith.constant 0 : i32
    return %arg0, %c0_i32 : i32, i32
  }
  func.func @transform_1(%arg0: i32) -> (i32, i32) {
    %c0_i32 = arith.constant 0 : i32
    %c0_i32_0 = arith.constant 0 : i32
    %c0_i32_1 = arith.constant 0 : i32
    return %c0_i32, %c0_i32_0 : i32, i32
  }
  func.func @transform_2(%arg0: i32) -> (i32, i32) {
    %c0_i32 = arith.constant 0 : i32
    %c0_i32_0 = arith.constant 0 : i32
    %c0_i32_1 = arith.constant 0 : i32
    return %c0_i32, %c0_i32_0 : i32, i32
  }
  func.func @transform_3(%arg0: i32) -> (i32, i32) {
    %c0_i32 = arith.constant 0 : i32
    %c0_i32_0 = arith.constant 0 : i32
    %c0_i32_1 = arith.constant 0 : i32
    return %c0_i32, %c0_i32_0 : i32, i32
  }
  func.func @transform_4(%arg0: i32) -> (i32, i32, i32) {
    %c0_i32 = arith.constant 0 : i32
    %c0_i32_0 = arith.constant 0 : i32
    %c0_i32_1 = arith.constant 0 : i32
    %c0_i32_2 = arith.constant 0 : i32
    return %c0_i32, %c0_i32_0, %c0_i32_1 : i32, i32, i32
  }
  func.func @transform_5(%arg0: i32) -> (i32, i32, i32) {
    %c0_i32 = arith.constant 0 : i32
    %c0_i32_0 = arith.constant 0 : i32
    %c0_i32_1 = arith.constant 0 : i32
    %c0_i32_2 = arith.constant 0 : i32
    return %c0_i32, %c0_i32_0, %c0_i32_1 : i32, i32, i32
  }
  func.func @transform_6(%arg0: i32) -> (i32, i32, i32) {
    %c0_i32 = arith.constant 0 : i32
    %c0_i32_0 = arith.constant 0 : i32
    %c0_i32_1 = arith.constant 0 : i32
    %c0_i32_2 = arith.constant 0 : i32
    return %c0_i32, %c0_i32_0, %c0_i32_1 : i32, i32, i32
  }
  func.func @transform_7(%arg0: i32) -> (i32, i32) {
    %c0_i32 = arith.constant 0 : i32
    %c0_i32_0 = arith.constant 0 : i32
    %c0_i32_1 = arith.constant 0 : i32
    return %c0_i32, %c0_i32_0 : i32, i32
  }
  func.func @transform_8(%arg0: i32) -> (i32, i32) {
    %c0_i32 = arith.constant 0 : i32
    %c0_i32_0 = arith.constant 0 : i32
    %c0_i32_1 = arith.constant 0 : i32
    return %c0_i32, %c0_i32_0 : i32, i32
  }
  func.func @transform_9(%arg0: i32) -> (i32, i32) {
    %c0_i32 = arith.constant 0 : i32
    %c0_i32_0 = arith.constant 0 : i32
    return %arg0, %c0_i32 : i32, i32
  }
}

</mosaic_0001>

<bundles_post_ra>
// kernel: tpu_custom_call.1
= control target key start
LH: loop header
LB: loop body
LE: loop exit
PB: predicated region body
PF: predicated region fallthrough
CT: control target
= control target key end

     0   :  { %14 = vsyncpa [#allocation5], 0  ;;  %s4636_s0 = inlined_call_operand.vmem [shape: f32[16,4], index: 0, kind: input, shape index: {}]   ;;  %s4637_s1 = inlined_call_operand.vmem [shape: f32[2,128], index: 1, kind: input, shape index: {}]   ;;  %s4638_s2 = inlined_call_operand.vmem [shape: f32[4,32], index: 2, kind: input, shape index: {}]   ;;  %s4639_s3 = inlined_call_operand.hbm [shape: f32[1,32], index: 3, kind: input, shape index: {}]   ;;  %s4640_s4 = inlined_call_operand.vmem [shape: f32[2,32,128], index: 4, kind: input, shape index: {}]   ;;  %s4641_s5 = inlined_call_operand.hbm [shape: f32[2,32,128], index: 5, kind: input, shape index: {}]   ;;  %s4642_s6 = inlined_call_operand.vmem [shape: f32[2,1,128], index: 6, kind: input, shape index: {}]   ;;  %s4643_s7 = inlined_call_operand.vmem [shape: f32[32,4], index: 7, kind: input, shape index: {}]   ;;  %s4644_s8 = inlined_call_operand.vmem [shape: f32[1,4], index: 8, kind: input, shape index: {}]   ;;  %s4645_s9 = inlined_call_operand.vmem [shape: f32[16,4], index: 9, kind: output, shape index: {}]  }
   0x1   :  { %15 = vsyncpa [#allocation7], 0  ;;  %s4065_s30 = smov [#allocation4]   ;;  %s4066_s11 = smov [#allocation6]  }
   0x2   :  { %s28_s10 = sshll.u32 %s4065_s30, 4  ;;  %s39_s12 = sshll.u32 %s4066_s11, 4  ;;  %s29_s10 = int_to_ptr.vmem [resolvable:$true] %s28_s10  ;;  %s4125_s12 = int_to_ptr.vmem [resolvable:$true] %s39_s12 }
   0x3   :  { %s4017_s15 = scalar_lea.hbm %s4639_s3, 16 }
   0x4   :  { %p4018_p0 = scmp.ne.s32.totalorder %s4639_s3, %s4017_s15  ;;  %p4021_p1 = scmp.lt.u32.totalorder %s4017_s15, %s4639_s3 }
   0x6   :  { %p4023_p2 = pnand %p4021_p1, %p4018_p0 }
   0x8   :  { %4026 = shalt.err (!%p4023_p2)
}
   0x9   :  { %s4027_s20 = scalar_lea.vmem %s29_s10, 16  ;;  %s4031_s21 = scalar_lea.vmem %s29_s10, 32 }
   0xa   :  { %p4028_p3 = scmp.ne.s32.totalorder %s29_s10, %s4027_s20  ;;  %p4032_p4 = scmp.lt.s32.totalorder %s29_s10, %s29_s10 }
   0xb   :  { %p4033_p5 = scmp.lt.s32.totalorder %s4031_s21, %s4027_s20 }
   0xd   :  { %p4034_p6 = por %p4033_p5, %p4032_p4 }
   0xf   :  { %p4035_p7 = pnand %p4034_p6, %p4028_p3 }
  0x11   :  { %4038 = shalt.err (!%p4035_p7)
}
  0x12   :  { %31 = dma.hbm_to_vmem [thread:$0]  %s4639_s3, 16, %s29_s10, [#allocation5]  }
  0x13   :  { %s4039_s26 = scalar_lea.hbm %s4641_s5, 1024 }
  0x14   :  { %p4040_p8 = scmp.ne.s32.totalorder %s4641_s5, %s4039_s26  ;;  %p4043_p9 = scmp.lt.u32.totalorder %s4039_s26, %s4641_s5 }
  0x16   :  { %p4045_p10 = pnand %p4043_p9, %p4040_p8 }
  0x18   :  { %4048 = shalt.err (!%p4045_p10)
}
  0x19   :  { %s4049_s11 = scalar_lea.vmem %s4125_s12, 1024  ;;  %p4054_p12 = scmp.lt.s32.totalorder %s4125_s12, %s4125_s12 }
  0x1a   :  { %p4050_p11 = scmp.ne.s32.totalorder %s4125_s12, %s4049_s11  ;;  %p4055_p13 = scmp.lt.s32.totalorder %s4049_s11, %s4049_s11 }
  0x1c   :  { %p4056_p0 = por %p4055_p13, %p4054_p12 }
  0x1e   :  { %p4057_p1 = pnand %p4056_p0, %p4050_p11 }
  0x20   :  { %4060 = shalt.err (!%p4057_p1)
}
  0x21   :  { %s4067_s3 = smov 128   ;;  %s4068_s10 = smov 8  }
  0x22   :  { %45 = dma.hbm_to_vmem [thread:$0]  %s4641_s5, 1024, %s4125_s12, [#allocation7], %s4067_s3, %s4067_s3, %s4068_s10  }
  0x23   :  { %4061 = dma.done.wait [#allocation5], 16  }
  0x24   :  { %4062 = vsyncadd [#allocation5], 4294967280 }
  0x25   :  { %4063 = dma.done.wait [#allocation7], 1024  }
  0x26   :  { %4064 = vsyncadd [#allocation7], 4294966272  ;;  %v4069_v0 = vmov 0.0|0.0   ;;  %vm81_vm0 = vcmask 1043456   ;;  %vm74_vm1 = vcmask 31744   ;;  %v64_v2 = vld [vmem:[%s4636_s0] sm:$0xff] }
  0x27   :  { %3677 = vmatprep.subr.bf16.mxu1 %v4069_v0  ;;  %v66_v1 = vld [vmem:[%s4638_s2] sm:$0xf]  ;;  %v65_v3 = vld [vmem:[%s4636_s0 + $0x8] sm:$0xff]  ;;  %3311 = vmatprep.mubr.msk.f32.mxu0 %vm74_vm1, %v64_v2  ;;  %v169_v4 = vld [vmem:[#allocation6] sm:$0xff]  ;;  %vm4070_vm2 = vmmov 0   ;;  %v4071_v17 = vmov 0.0  }
  0x28   :  { %3309 = vmatprep.subr.msk.mxu0 %vm81_vm0, %v66_v1  ;;  %v170_v5 = vld [vmem:[#allocation6 + $0x8] sm:$0xff]  ;;  %v161_v8 = vld [vmem:[%s4640_s4 + $0x8] sm:$0xff]  ;;  %v162_v14 = vld [vmem:[%s4640_s4 + $0x10] sm:$0xff]  ;;  %3322 = vmatprep.mubr.msk.f32.mxu1 %vm4070_vm2, %v4071_v17  ;;  %vm194_vm3 = vcmask 261120   ;;  %s4072_s28 = smov 64   ;;  %s4073_s29 = smov 32  }
  0x29   :  { %v160_v6 = vld [vmem:[%s4640_s4] sm:$0xff]  ;;  %3310 = vmatpush3.msk.msra.mxu0 %vm81_vm0, %v66_v1  ;;  %v4170_v7 = vpack.c.bf16 %v170_v5, %v169_v4  ;;  %v172_v12 = vld [vmem:[#allocation6 + $0x18] sm:$0xff]  ;;  %v163_v15 = vld [vmem:[%s4640_s4 + $0x18] sm:$0xff]  ;;  %vm545_vm4 = vcmask 254976   ;;  %s4074_s25 = smov 96   ;;  %vm2971_vm5 = vcmask 523264  }
  0x2a   :  { %3312 = vmatmul.mubr.msk.f32.vlgmr.msra.gmra.mrb[0].mxu0 %vm74_vm1, %v65_v3  ;;  %3683 = vmatprep.subr.bf16.mxu0 %v4069_v0  ;;  %v4177_v9 = vpack.c.bf16 %v161_v8, %v160_v6  ;;  %v62_v10 = vld [vmem:[%s4637_s1] sm:$0x3]  ;;  %v171_v11 = vld [vmem:[#allocation6 + $0x10] sm:$0xff]  ;;  %v4194_v16 = vpack.c.bf16 %v163_v15, %v162_v14  ;;  %v3078_v19 = vld [vmem:[#allocation4] ss:$0 sm:$0xff]  ;;  %vm2973_vm6 = vcmask 785408  }
  0x2b   :  { %3679 = vmatpush3.bf16.msra.mxu1 %v4170_v7  ;;  %63 = vst [vmem:[#allocation2] sm:$0x3] %v62_v10  ;;  %v4186_v13 = vpack.c.bf16 %v172_v12, %v171_v11  ;;  %3333 = vmatprep.mubr.msk.f32.mxu0 %vm4070_vm2, %v4071_v17  ;;  %v4218_v26 = vld [vmem:[%s4642_s6] ss:$0 sm:$0xff]  ;;  %v174_v41 = vld [vmem:[#allocation6 + $0x20] sm:$0xff]  ;;  %v176_v43 = vld [vmem:[#allocation6 + $0x30] sm:$0xff] }
  0x2c   :  { %3685 = vmatpush3.bf16.msra.mxu0 %v4177_v9  ;;  %3680 = vmatprep.subr.bf16.mxu1 %v4069_v0  ;;  %v175_v42 = vld [vmem:[#allocation6 + $0x28] sm:$0xff]  ;;  %v177_v45 = vld [vmem:[#allocation6 + $0x38] sm:$0xff] }
  0x2d   :  { %3686 = vmatprep.subr.bf16.mxu0 %v4069_v0  ;;  %v4226_v44 = vpack.c.bf16 %v175_v42, %v174_v41  ;;  %v3082_v46 = vld [vmem:[%s4640_s4 + $0x20] sm:$0xff]  ;;  %v3083_v47 = vld [vmem:[%s4640_s4 + $0x28] sm:$0xff]  ;;  %v4237_v49 = vpack.c.bf16 %v177_v45, %v176_v43  ;;  %v3084_v50 = vld [vmem:[%s4640_s4 + $0x30] sm:$0xff] }
  0x2e   :  { %v4234_v48 = vpack.c.bf16 %v3083_v47, %v3082_v46  ;;  %v3085_v51 = vld [vmem:[%s4640_s4 + $0x38] sm:$0xff]  ;;  %v4292_v61 = vld [vmem:[%s4642_s6 + $0x1] ss:$0 sm:$0xff] }
  0x2f   :  { %3682 = vmatpush3.bf16.msra.mxu1 %v4186_v13  ;;  %v4247_v52 = vpack.c.bf16 %v3085_v51, %v3084_v50 }
  0x30   :  { %3688 = vmatpush3.bf16.msra.mxu0 %v4194_v16  ;;  %3689 = vmatprep.subr.bf16.mxu1 %v4069_v0 }
  0x31   :  { %3695 = vmatprep.subr.bf16.mxu0 %v4069_v0 }
  0x32   :  { %v193_v18 = vld [vmem:[#allocation2] sm:$0x3] }
  0x33   :  { %3323 = vmatmul.mubr.msk.f32.vlgmr.msra.gmra.mrb[0].mxu1 %vm194_vm3, %v193_v18 }
  0x34   :  { %3344 = vmatprep.mubr.msk.f32.mxu1 %vm4070_vm2, %v4071_v17  ;;  %3691 = vmatpush3.bf16.msra.mxu1 %v4226_v44 }
  0x35   :  { %3692 = vmatprep.subr.bf16.mxu1 %v4069_v0 }
  0x38   :  { %3694 = vmatpush3.bf16.msra.mxu1 %v4237_v49 }
  0x39   :  { %3701 = vmatprep.subr.bf16.mxu1 %v4069_v0 }
  0xfd   :  { %v3313_v20 = vpop.f32.mrb[0].mxu0 }
  0xfe   :  { %v4207_v21 = vadd.f32 %v3313_v20, %v3078_v19  ;;  %v151_v22 = vpop.f32.mrb[1].mxu0 }
  0xff   :  { %v4209_v23 = vadd.f32 %v3078_v19, %v151_v22 }
 0x101   :  { %3334 = vmatmul.mubr.msk.f32.vlgmr.msra.gmra.mrb[2].mxu0 %vm194_vm3, %v4209_v23  ;;  %v617_v58 = vrot.slane %v4209_v23, 2  ;;  %v962_v46 = vrot.slane %v4209_v23, 4 }
 0x102   :  { %3355 = vmatprep.mubr.msk.f32.mxu0 %vm4070_vm2, %v4071_v17  ;;  %3697 = vmatpush3.bf16.msra.mxu0 %v4234_v48 }
 0x103   :  { %3698 = vmatprep.subr.bf16.mxu0 %v4069_v0 }
 0x106   :  { %v264_v24 = vpop.f32.mrb[0].mxu1  ;;  %3700 = vmatpush3.bf16.msra.mxu0 %v4247_v52 }
 0x107   :  { %v3324_v25 = vpop.f32.mrb[1].mxu1  ;;  %3707 = vmatprep.subr.bf16.mxu0 %v4069_v0 }
 0x1d4   :  { %v337_v27 = vpop.f32.mrb[2].mxu0 }
 0x1d5   :  { %v338_v28 = vadd.f32 %v337_v27, %v264_v24  ;;  %v3335_v29 = vpop.f32.mrb[3].mxu0 }
 0x1d7   :  { %v341_v30 = vadd.f32 %v4218_v26, %v338_v28 }
 0x1d9   :  { %3887 = vtanh.f32 %v341_v30  ;;  %v3091_v32 = vmul.f32 -1.442695, %v341_v30 }
 0x1db   :  { %3889 = vpow2.f32 %v3091_v32 }
 0x1e3   :  { %v3888_v31 = vpop.eup %3887 }
 0x1e4   :  { %351 = vrot.lane.b32.xlu0 %v3888_v31, %s4072_s28 }
 0x1e5   :  { %v3890_v33 = vpop.eup %3889 }
 0x1e6   :  { %v345_v34 = vadd.f32 1.0, %v3890_v33 }
 0x1e8   :  { %3891 = vrcp.f32 %v345_v34 }
 0x1f2   :  { %v3892_v35 = vpop.eup %3891 }
 0x1f3   :  { %v349_v38 = vmul.f32 %v3892_v35, %v193_v18 }
 0x256   :  { %v352_v36 = vpop.permute.xlu0 %351 }
 0x257   :  { %v354_v37 = vmul.f32 %v3892_v35, %v352_v36 }
 0x259   :  { %356 = vrot.lane.b32.xlu0 %v354_v37, %s4073_s29 }
 0x2cb   :  { %v357_v39 = vpop.permute.xlu0 %356 }
 0x2cc   :  { %v4223_v40 = vadd.f32 %v357_v39, %v349_v38 }
 0x2ce   :  { %3893 = vtanh.f32 %v4223_v40 }
 0x2d8   :  { %v3894_v53 = vpop.eup %3893 }
 0x2d9   :  { %362 = vrot.lane.b32.xlu1 %v3894_v53, %s4072_s28 }
 0x2dd   :  { %366 = vrot.lane.b32.xlu1 %v193_v18, %s4072_s28 }
 0x34b   :  { %v363_v54 = vpop.permute.xlu1 %362 }
 0x34c   :  { %v365_v55 = vmul.f32 %v3892_v35, %v363_v54 }
 0x34e   :  { %441 = vrot.lane.b32.xlu0 %v365_v55, %s4073_s29 }
 0x34f   :  { %v4257_v56 = vpop.permute.xlu1 %366 }
 0x350   :  { %3345 = vmatmul.mubr.msk.f32.vlgmr.msra.gmra.mrb[2].mxu1 %vm194_vm3, %v4257_v56 }
 0x351   :  { %3703 = vmatpush3.bf16.msra.mxu1 %v4170_v7  ;;  %3366 = vmatprep.mubr.msk.f32.mxu1 %vm4070_vm2, %v4071_v17 }
 0x352   :  { %3704 = vmatprep.subr.bf16.mxu1 %v4069_v0 }
 0x355   :  { %3706 = vmatpush3.bf16.msra.mxu1 %v4186_v13 }
 0x356   :  { %3713 = vmatprep.subr.bf16.mxu1 %v4069_v0 }
 0x3c0   :  { %v442_v57 = vpop.permute.xlu0 %441 }
 0x3c1   :  { %3356 = vmatmul.mubr.msk.f32.vlgmr.msra.gmra.mrb[4].mxu0 %vm194_vm3, %v442_v57  ;;  %3367 = vmatmul.mubr.msk.f32.vlgmr.msra.gmra.mrb[4].mxu1 %vm194_vm3, %v442_v57 }
 0x3c2   :  { %3709 = vmatpush3.bf16.msra.mxu0 %v4177_v9  ;;  %3377 = vmatprep.mubr.msk.f32.mxu0 %vm4070_vm2, %v4071_v17 }
 0x3c3   :  { %3710 = vmatprep.subr.bf16.mxu0 %v4069_v0  ;;  %3715 = vmatpush3.bf16.msra.mxu1 %v4226_v44 }
 0x3c4   :  { %3716 = vmatprep.subr.bf16.mxu1 %v4069_v0  ;;  %3388 = vmatprep.mubr.msk.f32.mxu1 %vm4070_vm2, %v4071_v17 }
 0x3c6   :  { %3712 = vmatpush3.bf16.msra.mxu0 %v4194_v16 }
 0x3c7   :  { %3718 = vmatpush3.bf16.msra.mxu1 %v4237_v49  ;;  %3719 = vmatprep.subr.bf16.mxu0 %v4069_v0 }
 0x3c8   :  { %3725 = vmatprep.subr.bf16.mxu1 %v4069_v0 }
 0x3c9   :  { %3378 = vmatmul.mubr.msk.f32.vlgmr.msra.gmra.mrb[6].mxu0 %vm194_vm3, %v617_v58 }
 0x3ca   :  { %3721 = vmatpush3.bf16.msra.mxu0 %v4234_v48  ;;  %3399 = vmatprep.mubr.msk.f32.mxu0 %vm4070_vm2, %v4071_v17 }
 0x3cb   :  { %3722 = vmatprep.subr.bf16.mxu0 %v4069_v0 }
 0x3ce   :  { %3724 = vmatpush3.bf16.msra.mxu0 %v4247_v52 }
 0x3cf   :  { %3731 = vmatprep.subr.bf16.mxu0 %v4069_v0 }
 0x423   :  { %v436_v59 = vpop.f32.mrb[2].mxu1 }
 0x424   :  { %v3346_v60 = vpop.f32.mrb[3].mxu1 }
 0x494   :  { %v511_v62 = vpop.f32.mrb[4].mxu0  ;;  %v613_v63 = vpop.f32.mrb[4].mxu1 }
 0x495   :  { %v512_v1 = vadd.f32 %v511_v62, %v436_v59  ;;  %v3357_v2 = vpop.f32.mrb[5].mxu0  ;;  %v3368_v3 = vpop.f32.mrb[5].mxu1 }
 0x497   :  { %v515_v4 = vadd.f32 %v4292_v61, %v512_v1 }
 0x499   :  { %3895 = vtanh.f32 %v515_v4  ;;  %v3094_v14 = vmul.f32 -1.442695, %v515_v4 }
 0x49c   :  { %v686_v5 = vpop.f32.mrb[6].mxu0 }
 0x49d   :  { %v687_v6 = vadd.f32 %v686_v5, %v613_v63  ;;  %v3379_v8 = vpop.f32.mrb[7].mxu0 }
 0x49f   :  { %v690_v10 = vadd.f32 %v4218_v26, %v687_v6 }
 0x4a1   :  { %3897 = vtanh.f32 %v690_v10  ;;  %v3097_v15 = vmul.f32 -1.442695, %v690_v10 }
 0x4a2   :  { %3899 = vpow2.f32 %v3094_v14 }
 0x4a3   :  { %v3896_v11 = vpop.eup %3895  ;;  %3901 = vpow2.f32 %v3097_v15 }
 0x4a4   :  { %526 = vrot.lane.b32.xlu1 %v3896_v11, %s4072_s28 }
 0x4ab   :  { %v3898_v12 = vpop.eup %3897 }
 0x4ac   :  { %700 = vrot.lane.b32.xlu0 %v3898_v12, %s4072_s28  ;;  %v3900_v18 = vpop.eup %3899 }
 0x4ad   :  { %v519_v19 = vadd.f32 1.0, %v3900_v18  ;;  %v3902_v20 = vpop.eup %3901 }
 0x4ae   :  { %v694_v22 = vadd.f32 1.0, %v3902_v20 }
 0x4af   :  { %3903 = vrcp.f32 %v519_v19 }
 0x4b0   :  { %3905 = vrcp.f32 %v694_v22 }
 0x4b9   :  { %v3904_v24 = vpop.eup %3903 }
 0x4ba   :  { %v3906_v28 = vpop.eup %3905  ;;  %v524_v31 = vmul.f32 %v3904_v24, %v4257_v56 }
 0x4bb   :  { %v698_v34 = vmul.f32 %v3906_v28, %v4223_v40 }
 0x516   :  { %v527_v25 = vpop.permute.xlu1 %526 }
 0x517   :  { %v529_v27 = vmul.f32 %v3904_v24, %v527_v25 }
 0x519   :  { %531 = vrot.lane.b32.xlu1 %v529_v27, %s4073_s29 }
 0x51e   :  { %v701_v29 = vpop.permute.xlu0 %700 }
 0x51f   :  { %v703_v30 = vmul.f32 %v3906_v28, %v701_v29 }
 0x521   :  { %705 = vrot.lane.b32.xlu0 %v703_v30, %s4073_s29 }
 0x58b   :  { %v532_v32 = vpop.permute.xlu1 %531 }
 0x58c   :  { %v4301_v33 = vadd.f32 %v532_v32, %v524_v31 }
 0x58e   :  { %3907 = vtanh.f32 %v4301_v33 }
 0x593   :  { %v706_v35 = vpop.permute.xlu0 %705 }
 0x594   :  { %v4305_v36 = vadd.f32 %v706_v35, %v698_v34 }
 0x596   :  { %3909 = vtanh.f32 %v4305_v36 }
 0x598   :  { %v3908_v37 = vpop.eup %3907 }
 0x599   :  { %537 = vrot.lane.b32.xlu1 %v3908_v37, %s4072_s28 }
 0x5a0   :  { %v3910_v38 = vpop.eup %3909 }
 0x5a1   :  { %711 = vrot.lane.b32.xlu0 %v3910_v38, %s4072_s28 }
 0x60b   :  { %v538_v39 = vpop.permute.xlu1 %537 }
 0x60c   :  { %v540_v41 = vmul.f32 %v3904_v24, %v538_v39 }
 0x60e   :  { %542 = vrot.lane.b32.xlu1 %v540_v41, %s4073_s29 }
 0x613   :  { %v712_v42 = vpop.permute.xlu0 %711 }
 0x614   :  { %v714_v43 = vmul.f32 %v3906_v28, %v712_v42 }
 0x616   :  { %788 = vrot.lane.b32.xlu0 %v714_v43, %s4073_s29 }
 0x680   :  { %v543_v40 = vpop.permute.xlu1 %542 }
 0x681   :  { %546 = vst.msk [vmem:[#allocation3] sm:$0x3] %vm545_vm4, %v543_v40  ;;  %3389 = vmatmul.mubr.msk.f32.vlgmr.msra.gmra.mrb[6].mxu1 %vm194_vm3, %v543_v40 }
 0x682   :  { %3727 = vmatpush3.bf16.msra.mxu1 %v4170_v7  ;;  %3410 = vmatprep.mubr.msk.f32.mxu1 %vm4070_vm2, %v4071_v17 }
 0x683   :  { %3728 = vmatprep.subr.bf16.mxu1 %v4069_v0 }
 0x686   :  { %3730 = vmatpush3.bf16.msra.mxu1 %v4186_v13 }
 0x687   :  { %3737 = vmatprep.subr.bf16.mxu1 %v4069_v0 }
 0x688   :  { %v789_v45 = vpop.permute.xlu0 %788 }
 0x689   :  { %3400 = vmatmul.mubr.msk.f32.vlgmr.msra.gmra.mrb[8].mxu0 %vm194_vm3, %v789_v45  ;;  %3411 = vmatmul.mubr.msk.f32.vlgmr.msra.gmra.mrb[8].mxu1 %vm194_vm3, %v789_v45 }
 0x68a   :  { %3733 = vmatpush3.bf16.msra.mxu0 %v4177_v9  ;;  %3421 = vmatprep.mubr.msk.f32.mxu0 %vm4070_vm2, %v4071_v17 }
 0x68b   :  { %3734 = vmatprep.subr.bf16.mxu0 %v4069_v0  ;;  %3739 = vmatpush3.bf16.msra.mxu1 %v4226_v44 }
 0x68c   :  { %3740 = vmatprep.subr.bf16.mxu1 %v4069_v0  ;;  %3432 = vmatprep.mubr.msk.f32.mxu1 %vm4070_vm2, %v4071_v17 }
 0x68e   :  { %3736 = vmatpush3.bf16.msra.mxu0 %v4194_v16 }
 0x68f   :  { %3742 = vmatpush3.bf16.msra.mxu1 %v4237_v49  ;;  %3743 = vmatprep.subr.bf16.mxu0 %v4069_v0 }
 0x690   :  { %3749 = vmatprep.subr.bf16.mxu1 %v4069_v0 }
 0x691   :  { %3422 = vmatmul.mubr.msk.f32.vlgmr.msra.gmra.mrb[10].mxu0 %vm194_vm3, %v962_v46 }
 0x692   :  { %3745 = vmatpush3.bf16.msra.mxu0 %v4234_v48  ;;  %3443 = vmatprep.mubr.msk.f32.mxu0 %vm4070_vm2, %v4071_v17 }
 0x693   :  { %3746 = vmatprep.subr.bf16.mxu0 %v4069_v0 }
 0x696   :  { %3748 = vmatpush3.bf16.msra.mxu0 %v4247_v52 }
 0x697   :  { %3755 = vmatprep.subr.bf16.mxu0 %v4069_v0 }
 0x754   :  { %v783_v47 = vpop.f32.mrb[6].mxu1 }
 0x755   :  { %v3390_v50 = vpop.f32.mrb[7].mxu1 }
 0x75c   :  { %v858_v51 = vpop.f32.mrb[8].mxu0  ;;  %v958_v53 = vpop.f32.mrb[8].mxu1 }
 0x75d   :  { %v859_v54 = vadd.f32 %v858_v51, %v783_v47  ;;  %v3401_v55 = vpop.f32.mrb[9].mxu0  ;;  %v3412_v56 = vpop.f32.mrb[9].mxu1 }
 0x75f   :  { %v862_v57 = vadd.f32 %v4292_v61, %v859_v54 }
 0x761   :  { %3911 = vtanh.f32 %v862_v57  ;;  %v3100_v2 = vmul.f32 -1.442695, %v862_v57 }
 0x764   :  { %v1031_v58 = vpop.f32.mrb[10].mxu0 }
 0x765   :  { %v1032_v59 = vadd.f32 %v1031_v58, %v958_v53  ;;  %v3423_v60 = vpop.f32.mrb[11].mxu0 }
 0x767   :  { %v1035_v62 = vadd.f32 %v4218_v26, %v1032_v59 }
 0x769   :  { %3913 = vtanh.f32 %v1035_v62  ;;  %v3103_v3 = vmul.f32 -1.442695, %v1035_v62 }
 0x76a   :  { %3915 = vpow2.f32 %v3100_v2 }
 0x76b   :  { %v3912_v63 = vpop.eup %3911  ;;  %3917 = vpow2.f32 %v3103_v3 }
 0x76c   :  { %872 = vrot.lane.b32.xlu1 %v3912_v63, %s4072_s28 }
 0x773   :  { %v3914_v1 = vpop.eup %3913 }
 0x774   :  { %1045 = vrot.lane.b32.xlu0 %v3914_v1, %s4072_s28  ;;  %v3916_v4 = vpop.eup %3915 }
 0x775   :  { %v866_v5 = vadd.f32 1.0, %v3916_v4  ;;  %v3918_v6 = vpop.eup %3917 }
 0x776   :  { %v1039_v8 = vadd.f32 1.0, %v3918_v6 }
 0x777   :  { %3919 = vrcp.f32 %v866_v5 }
 0x778   :  { %3921 = vrcp.f32 %v1039_v8 }
 0x781   :  { %v3920_v10 = vpop.eup %3919 }
 0x782   :  { %v3922_v14 = vpop.eup %3921  ;;  %v870_v19 = vmul.f32 %v3920_v10, %v4301_v33 }
 0x783   :  { %v1043_v24 = vmul.f32 %v3922_v14, %v4305_v36  ;;  %v1307_v36 = vrot.slane %v4209_v23, 6 }
 0x7de   :  { %v873_v11 = vpop.permute.xlu1 %872 }
 0x7df   :  { %v875_v12 = vmul.f32 %v3920_v10, %v873_v11 }
 0x7e1   :  { %877 = vrot.lane.b32.xlu1 %v875_v12, %s4073_s29 }
 0x7e6   :  { %v1046_v15 = vpop.permute.xlu0 %1045 }
 0x7e7   :  { %v1048_v18 = vmul.f32 %v3922_v14, %v1046_v15 }
 0x7e9   :  { %1050 = vrot.lane.b32.xlu0 %v1048_v18, %s4073_s29 }
 0x853   :  { %v878_v20 = vpop.permute.xlu1 %877 }
 0x854   :  { %v4349_v22 = vadd.f32 %v878_v20, %v870_v19 }
 0x856   :  { %3923 = vtanh.f32 %v4349_v22 }
 0x85b   :  { %v1051_v25 = vpop.permute.xlu0 %1050 }
 0x85c   :  { %v4353_v27 = vadd.f32 %v1051_v25, %v1043_v24 }
 0x85e   :  { %3925 = vtanh.f32 %v4353_v27 }
 0x860   :  { %v3924_v28 = vpop.eup %3923 }
 0x861   :  { %883 = vrot.lane.b32.xlu1 %v3924_v28, %s4072_s28 }
 0x868   :  { %v3926_v29 = vpop.eup %3925 }
 0x869   :  { %1056 = vrot.lane.b32.xlu0 %v3926_v29, %s4072_s28 }
 0x8d3   :  { %v884_v30 = vpop.permute.xlu1 %883 }
 0x8d4   :  { %v886_v31 = vmul.f32 %v3920_v10, %v884_v30 }
 0x8d6   :  { %888 = vrot.lane.b32.xlu1 %v886_v31, %s4073_s29 }
 0x8db   :  { %v1057_v32 = vpop.permute.xlu0 %1056 }
 0x8dc   :  { %v1059_v33 = vmul.f32 %v3922_v14, %v1057_v32 }
 0x8de   :  { %1133 = vrot.lane.b32.xlu0 %v1059_v33, %s4073_s29 }
 0x948   :  { %v889_v34 = vpop.permute.xlu1 %888 }
 0x949   :  { %891 = vst.msk [vmem:[#allocation3 + $0x2] sm:$0x3] %vm545_vm4, %v889_v34  ;;  %3433 = vmatmul.mubr.msk.f32.vlgmr.msra.gmra.mrb[10].mxu1 %vm194_vm3, %v889_v34 }
 0x94a   :  { %3751 = vmatpush3.bf16.msra.mxu1 %v4170_v7  ;;  %3454 = vmatprep.mubr.msk.f32.mxu1 %vm4070_vm2, %v4071_v17 }
 0x94b   :  { %3752 = vmatprep.subr.bf16.mxu1 %v4069_v0 }
 0x94e   :  { %3754 = vmatpush3.bf16.msra.mxu1 %v4186_v13 }
 0x94f   :  { %3761 = vmatprep.subr.bf16.mxu1 %v4069_v0 }
 0x950   :  { %v1134_v35 = vpop.permute.xlu0 %1133 }
 0x951   :  { %3444 = vmatmul.mubr.msk.f32.vlgmr.msra.gmra.mrb[12].mxu0 %vm194_vm3, %v1134_v35  ;;  %3455 = vmatmul.mubr.msk.f32.vlgmr.msra.gmra.mrb[12].mxu1 %vm194_vm3, %v1134_v35 }
 0x952   :  { %3757 = vmatpush3.bf16.msra.mxu0 %v4177_v9  ;;  %3465 = vmatprep.mubr.msk.f32.mxu0 %vm4070_vm2, %v4071_v17 }
 0x953   :  { %3758 = vmatprep.subr.bf16.mxu0 %v4069_v0  ;;  %3763 = vmatpush3.bf16.msra.mxu1 %v4226_v44 }
 0x954   :  { %3764 = vmatprep.subr.bf16.mxu1 %v4069_v0  ;;  %3476 = vmatprep.mubr.msk.f32.mxu1 %vm4070_vm2, %v4071_v17 }
 0x956   :  { %3760 = vmatpush3.bf16.msra.mxu0 %v4194_v16 }
 0x957   :  { %3766 = vmatpush3.bf16.msra.mxu1 %v4237_v49  ;;  %3767 = vmatprep.subr.bf16.mxu0 %v4069_v0 }
 0x958   :  { %3773 = vmatprep.subr.bf16.mxu1 %v4069_v0 }
 0x959   :  { %3466 = vmatmul.mubr.msk.f32.vlgmr.msra.gmra.mrb[14].mxu0 %vm194_vm3, %v1307_v36 }
 0x95a   :  { %3769 = vmatpush3.bf16.msra.mxu0 %v4234_v48  ;;  %3487 = vmatprep.mubr.msk.f32.mxu0 %vm4070_vm2, %v4071_v17 }
 0x95b   :  { %3770 = vmatprep.subr.bf16.mxu0 %v4069_v0 }
 0x95e   :  { %3772 = vmatpush3.bf16.msra.mxu0 %v4247_v52 }
 0x95f   :  { %3779 = vmatprep.subr.bf16.mxu0 %v4069_v0 }
 0xa1c   :  { %v1128_v23 = vpop.f32.mrb[10].mxu1 }
 0xa1d   :  { %v3434_v37 = vpop.f32.mrb[11].mxu1 }
 0xa24   :  { %v1203_v38 = vpop.f32.mrb[12].mxu0  ;;  %v1303_v39 = vpop.f32.mrb[12].mxu1 }
 0xa25   :  { %v1204_v41 = vadd.f32 %v1203_v38, %v1128_v23  ;;  %v3445_v42 = vpop.f32.mrb[13].mxu0  ;;  %v3456_v43 = vpop.f32.mrb[13].mxu1 }
 0xa27   :  { %v1207_v40 = vadd.f32 %v4292_v61, %v1204_v41 }
 0xa29   :  { %3927 = vtanh.f32 %v1207_v40  ;;  %v3106_v54 = vmul.f32 -1.442695, %v1207_v40 }
 0xa2c   :  { %v1376_v45 = vpop.f32.mrb[14].mxu0 }
 0xa2d   :  { %v1377_v46 = vadd.f32 %v1376_v45, %v1303_v39  ;;  %v3467_v47 = vpop.f32.mrb[15].mxu0 }
 0xa2f   :  { %v1380_v50 = vadd.f32 %v4218_v26, %v1377_v46 }
 0xa31   :  { %3929 = vtanh.f32 %v1380_v50  ;;  %v3109_v55 = vmul.f32 -1.442695, %v1380_v50 }
 0xa32   :  { %3931 = vpow2.f32 %v3106_v54 }
 0xa33   :  { %v3928_v51 = vpop.eup %3927  ;;  %3933 = vpow2.f32 %v3109_v55 }
 0xa34   :  { %1217 = vrot.lane.b32.xlu1 %v3928_v51, %s4072_s28 }
 0xa3b   :  { %v3930_v53 = vpop.eup %3929 }
 0xa3c   :  { %1390 = vrot.lane.b32.xlu0 %v3930_v53, %s4072_s28  ;;  %v3932_v56 = vpop.eup %3931 }
 0xa3d   :  { %v1211_v57 = vadd.f32 1.0, %v3932_v56  ;;  %v3934_v58 = vpop.eup %3933 }
 0xa3e   :  { %v1384_v59 = vadd.f32 1.0, %v3934_v58 }
 0xa3f   :  { %3935 = vrcp.f32 %v1211_v57 }
 0xa40   :  { %3937 = vrcp.f32 %v1384_v59 }
 0xa49   :  { %v3936_v60 = vpop.eup %3935 }
 0xa4a   :  { %v3938_v1 = vpop.eup %3937  ;;  %v1215_v4 = vmul.f32 %v3936_v60, %v4349_v22 }
 0xa4b   :  { %v1388_v8 = vmul.f32 %v3938_v1, %v4353_v27 }
 0xaa6   :  { %v1218_v62 = vpop.permute.xlu1 %1217 }
 0xaa7   :  { %v1220_v63 = vmul.f32 %v3936_v60, %v1218_v62 }
 0xaa9   :  { %1222 = vrot.lane.b32.xlu1 %v1220_v63, %s4073_s29 }
 0xaae   :  { %v1391_v2 = vpop.permute.xlu0 %1390 }
 0xaaf   :  { %v1393_v3 = vmul.f32 %v3938_v1, %v1391_v2 }
 0xab1   :  { %1395 = vrot.lane.b32.xlu0 %v1393_v3, %s4073_s29 }
 0xb1b   :  { %v1223_v5 = vpop.permute.xlu1 %1222 }
 0xb1c   :  { %v4397_v6 = vadd.f32 %v1223_v5, %v1215_v4 }
 0xb1e   :  { %3939 = vtanh.f32 %v4397_v6 }
 0xb23   :  { %v1396_v10 = vpop.permute.xlu0 %1395 }
 0xb24   :  { %v4401_v11 = vadd.f32 %v1396_v10, %v1388_v8  ;;  %v1997_v8 = vrot.slane %v4207_v21, 2 }
 0xb26   :  { %3941 = vtanh.f32 %v4401_v11 }
 0xb28   :  { %v3940_v12 = vpop.eup %3939 }
 0xb29   :  { %1228 = vrot.lane.b32.xlu1 %v3940_v12, %s4072_s28 }
 0xb30   :  { %v3942_v14 = vpop.eup %3941 }
 0xb31   :  { %1401 = vrot.lane.b32.xlu0 %v3942_v14, %s4072_s28 }
 0xb9b   :  { %v1229_v15 = vpop.permute.xlu1 %1228 }
 0xb9c   :  { %v1231_v18 = vmul.f32 %v3936_v60, %v1229_v15 }
 0xb9e   :  { %1233 = vrot.lane.b32.xlu1 %v1231_v18, %s4073_s29 }
 0xba3   :  { %v1402_v19 = vpop.permute.xlu0 %1401 }
 0xba4   :  { %v1404_v20 = vmul.f32 %v3938_v1, %v1402_v19 }
 0xba6   :  { %1478 = vrot.lane.b32.xlu0 %v1404_v20, %s4073_s29 }
 0xc10   :  { %v1234_v22 = vpop.permute.xlu1 %1233 }
 0xc11   :  { %1236 = vst.msk [vmem:[#allocation3 + $0x4] sm:$0x3] %vm545_vm4, %v1234_v22  ;;  %3477 = vmatmul.mubr.msk.f32.vlgmr.msra.gmra.mrb[14].mxu1 %vm194_vm3, %v1234_v22 }
 0xc12   :  { %3775 = vmatpush3.bf16.msra.mxu1 %v4170_v7  ;;  %3498 = vmatprep.mubr.msk.f32.mxu1 %vm4070_vm2, %v4071_v17 }
 0xc13   :  { %3776 = vmatprep.subr.bf16.mxu1 %v4069_v0 }
 0xc16   :  { %3778 = vmatpush3.bf16.msra.mxu1 %v4186_v13 }
 0xc17   :  { %3785 = vmatprep.subr.bf16.mxu1 %v4069_v0 }
 0xc18   :  { %v1479_v24 = vpop.permute.xlu0 %1478 }
 0xc19   :  { %3488 = vmatmul.mubr.msk.f32.vlgmr.msra.gmra.mrb[16].mxu0 %vm194_vm3, %v1479_v24  ;;  %3499 = vmatmul.mubr.msk.f32.vlgmr.msra.gmra.mrb[16].mxu1 %vm194_vm3, %v1479_v24 }
 0xc1a   :  { %3781 = vmatpush3.bf16.msra.mxu0 %v4177_v9  ;;  %3509 = vmatprep.mubr.msk.f32.mxu0 %vm4070_vm2, %v4071_v17 }
 0xc1b   :  { %3782 = vmatprep.subr.bf16.mxu0 %v4069_v0  ;;  %3787 = vmatpush3.bf16.msra.mxu1 %v4226_v44 }
 0xc1c   :  { %3788 = vmatprep.subr.bf16.mxu1 %v4069_v0  ;;  %3520 = vmatprep.mubr.msk.f32.mxu1 %vm4070_vm2, %v4071_v17 }
 0xc1e   :  { %3784 = vmatpush3.bf16.msra.mxu0 %v4194_v16 }
 0xc1f   :  { %3790 = vmatpush3.bf16.msra.mxu1 %v4237_v49  ;;  %3791 = vmatprep.subr.bf16.mxu0 %v4069_v0 }
 0xc20   :  { %3797 = vmatprep.subr.bf16.mxu1 %v4069_v0 }
 0xc21   :  { %3510 = vmatmul.mubr.msk.f32.vlgmr.msra.gmra.mrb[18].mxu0 %vm194_vm3, %v4207_v21 }
 0xc22   :  { %3793 = vmatpush3.bf16.msra.mxu0 %v4234_v48  ;;  %3531 = vmatprep.mubr.msk.f32.mxu0 %vm4070_vm2, %v4071_v17 }
 0xc23   :  { %3794 = vmatprep.subr.bf16.mxu0 %v4069_v0 }
 0xc26   :  { %3796 = vmatpush3.bf16.msra.mxu0 %v4247_v52 }
 0xc27   :  { %3803 = vmatprep.subr.bf16.mxu0 %v4069_v0 }
 0xce4   :  { %v1473_v25 = vpop.f32.mrb[14].mxu1 }
 0xce5   :  { %v3478_v27 = vpop.f32.mrb[15].mxu1 }
 0xcec   :  { %v1548_v28 = vpop.f32.mrb[16].mxu0  ;;  %v1648_v29 = vpop.f32.mrb[16].mxu1 }
 0xced   :  { %v1549_v30 = vadd.f32 %v1548_v28, %v1473_v25  ;;  %v3489_v31 = vpop.f32.mrb[17].mxu0  ;;  %v3500_v32 = vpop.f32.mrb[17].mxu1 }
 0xcef   :  { %v1552_v33 = vadd.f32 %v4292_v61, %v1549_v30 }
 0xcf1   :  { %3943 = vtanh.f32 %v1552_v33  ;;  %v3112_v39 = vmul.f32 -1.442695, %v1552_v33 }
 0xcf4   :  { %v1721_v34 = vpop.f32.mrb[18].mxu0 }
 0xcf5   :  { %v1722_v35 = vadd.f32 %v1721_v34, %v1648_v29  ;;  %v3511_v36 = vpop.f32.mrb[19].mxu0 }
 0xcf7   :  { %v1725_v23 = vadd.f32 %v4218_v26, %v1722_v35 }
 0xcf9   :  { %3945 = vtanh.f32 %v1725_v23  ;;  %v3115_v41 = vmul.f32 -1.442695, %v1725_v23 }
 0xcfa   :  { %3947 = vpow2.f32 %v3112_v39 }
 0xcfb   :  { %v3944_v37 = vpop.eup %3943  ;;  %3949 = vpow2.f32 %v3115_v41 }
 0xcfc   :  { %1562 = vrot.lane.b32.xlu1 %v3944_v37, %s4072_s28 }
 0xd03   :  { %v3946_v38 = vpop.eup %3945 }
 0xd04   :  { %1735 = vrot.lane.b32.xlu0 %v3946_v38, %s4072_s28  ;;  %v3948_v42 = vpop.eup %3947 }
 0xd05   :  { %v1556_v43 = vadd.f32 1.0, %v3948_v42  ;;  %v3950_v40 = vpop.eup %3949 }
 0xd06   :  { %v1729_v45 = vadd.f32 1.0, %v3950_v40 }
 0xd07   :  { %3951 = vrcp.f32 %v1556_v43 }
 0xd08   :  { %3953 = vrcp.f32 %v1729_v45 }
 0xd11   :  { %v3952_v46 = vpop.eup %3951 }
 0xd12   :  { %v3954_v51 = vpop.eup %3953  ;;  %v1560_v55 = vmul.f32 %v3952_v46, %v4397_v6 }
 0xd13   :  { %v1733_v58 = vmul.f32 %v3954_v51, %v4401_v11 }
 0xd6e   :  { %v1563_v47 = vpop.permute.xlu1 %1562 }
 0xd6f   :  { %v1565_v50 = vmul.f32 %v3952_v46, %v1563_v47 }
 0xd71   :  { %1567 = vrot.lane.b32.xlu1 %v1565_v50, %s4073_s29 }
 0xd76   :  { %v1736_v53 = vpop.permute.xlu0 %1735 }
 0xd77   :  { %v1738_v54 = vmul.f32 %v3954_v51, %v1736_v53 }
 0xd79   :  { %1740 = vrot.lane.b32.xlu0 %v1738_v54, %s4073_s29 }
 0xde3   :  { %v1568_v56 = vpop.permute.xlu1 %1567 }
 0xde4   :  { %v4445_v57 = vadd.f32 %v1568_v56, %v1560_v55 }
 0xde6   :  { %3955 = vtanh.f32 %v4445_v57 }
 0xdeb   :  { %v1741_v59 = vpop.permute.xlu0 %1740 }
 0xdec   :  { %v4449_v60 = vadd.f32 %v1741_v59, %v1733_v58  ;;  %v2342_v59 = vrot.slane %v4207_v21, 4 }
 0xdee   :  { %3957 = vtanh.f32 %v4449_v60 }
 0xdf0   :  { %v3956_v62 = vpop.eup %3955 }
 0xdf1   :  { %1573 = vrot.lane.b32.xlu1 %v3956_v62, %s4072_s28 }
 0xdf8   :  { %v3958_v63 = vpop.eup %3957 }
 0xdf9   :  { %1746 = vrot.lane.b32.xlu0 %v3958_v63, %s4072_s28 }
 0xe63   :  { %v1574_v1 = vpop.permute.xlu1 %1573 }
 0xe64   :  { %v1576_v2 = vmul.f32 %v3952_v46, %v1574_v1 }
 0xe66   :  { %1578 = vrot.lane.b32.xlu1 %v1576_v2, %s4073_s29 }
 0xe6b   :  { %v1747_v3 = vpop.permute.xlu0 %1746 }
 0xe6c   :  { %v1749_v4 = vmul.f32 %v3954_v51, %v1747_v3 }
 0xe6e   :  { %1823 = vrot.lane.b32.xlu0 %v1749_v4, %s4073_s29 }
 0xed8   :  { %v1579_v5 = vpop.permute.xlu1 %1578 }
 0xed9   :  { %1581 = vst.msk [vmem:[#allocation3 + $0x6] sm:$0x3] %vm545_vm4, %v1579_v5  ;;  %3521 = vmatmul.mubr.msk.f32.vlgmr.msra.gmra.mrb[18].mxu1 %vm194_vm3, %v1579_v5 }
 0xeda   :  { %3799 = vmatpush3.bf16.msra.mxu1 %v4170_v7  ;;  %3542 = vmatprep.mubr.msk.f32.mxu1 %vm4070_vm2, %v4071_v17 }
 0xedb   :  { %3800 = vmatprep.subr.bf16.mxu1 %v4069_v0 }
 0xede   :  { %3802 = vmatpush3.bf16.msra.mxu1 %v4186_v13 }
 0xedf   :  { %3809 = vmatprep.subr.bf16.mxu1 %v4069_v0 }
 0xee0   :  { %v1824_v6 = vpop.permute.xlu0 %1823 }
 0xee1   :  { %3532 = vmatmul.mubr.msk.f32.vlgmr.msra.gmra.mrb[20].mxu0 %vm194_vm3, %v1824_v6  ;;  %3543 = vmatmul.mubr.msk.f32.vlgmr.msra.gmra.mrb[20].mxu1 %vm194_vm3, %v1824_v6 }
 0xee2   :  { %3805 = vmatpush3.bf16.msra.mxu0 %v4177_v9  ;;  %3553 = vmatprep.mubr.msk.f32.mxu0 %vm4070_vm2, %v4071_v17 }
 0xee3   :  { %3806 = vmatprep.subr.bf16.mxu0 %v4069_v0  ;;  %3811 = vmatpush3.bf16.msra.mxu1 %v4226_v44 }
 0xee4   :  { %3812 = vmatprep.subr.bf16.mxu1 %v4069_v0  ;;  %3564 = vmatprep.mubr.msk.f32.mxu1 %vm4070_vm2, %v4071_v17 }
 0xee6   :  { %3808 = vmatpush3.bf16.msra.mxu0 %v4194_v16 }
 0xee7   :  { %3814 = vmatpush3.bf16.msra.mxu1 %v4237_v49  ;;  %3815 = vmatprep.subr.bf16.mxu0 %v4069_v0 }
 0xee8   :  { %3821 = vmatprep.subr.bf16.mxu1 %v4069_v0 }
 0xee9   :  { %3554 = vmatmul.mubr.msk.f32.vlgmr.msra.gmra.mrb[22].mxu0 %vm194_vm3, %v1997_v8 }
 0xeea   :  { %3817 = vmatpush3.bf16.msra.mxu0 %v4234_v48  ;;  %3575 = vmatprep.mubr.msk.f32.mxu0 %vm4070_vm2, %v4071_v17 }
 0xeeb   :  { %3818 = vmatprep.subr.bf16.mxu0 %v4069_v0 }
 0xeee   :  { %3820 = vmatpush3.bf16.msra.mxu0 %v4247_v52 }
 0xeef   :  { %3827 = vmatprep.subr.bf16.mxu0 %v4069_v0 }
 0xfac   :  { %v1818_v10 = vpop.f32.mrb[18].mxu1 }
 0xfad   :  { %v3522_v11 = vpop.f32.mrb[19].mxu1 }
 0xfb4   :  { %v1893_v12 = vpop.f32.mrb[20].mxu0  ;;  %v1993_v14 = vpop.f32.mrb[20].mxu1 }
 0xfb5   :  { %v1894_v15 = vadd.f32 %v1893_v12, %v1818_v10  ;;  %v3533_v18 = vpop.f32.mrb[21].mxu0  ;;  %v3544_v19 = vpop.f32.mrb[21].mxu1 }
 0xfb7   :  { %v1897_v20 = vadd.f32 %v4292_v61, %v1894_v15 }
 0xfb9   :  { %3959 = vtanh.f32 %v1897_v20  ;;  %v3118_v30 = vmul.f32 -1.442695, %v1897_v20 }
 0xfbc   :  { %v2066_v22 = vpop.f32.mrb[22].mxu0 }
 0xfbd   :  { %v2067_v24 = vadd.f32 %v2066_v22, %v1993_v14  ;;  %v3555_v25 = vpop.f32.mrb[23].mxu0 }
 0xfbf   :  { %v2070_v27 = vadd.f32 %v4218_v26, %v2067_v24 }
 0xfc1   :  { %3961 = vtanh.f32 %v2070_v27  ;;  %v3121_v31 = vmul.f32 -1.442695, %v2070_v27 }
 0xfc2   :  { %3963 = vpow2.f32 %v3118_v30 }
 0xfc3   :  { %v3960_v28 = vpop.eup %3959  ;;  %3965 = vpow2.f32 %v3121_v31 }
 0xfc4   :  { %1907 = vrot.lane.b32.xlu1 %v3960_v28, %s4072_s28 }
 0xfcb   :  { %v3962_v29 = vpop.eup %3961 }
 0xfcc   :  { %2080 = vrot.lane.b32.xlu0 %v3962_v29, %s4072_s28  ;;  %v3964_v32 = vpop.eup %3963 }
 0xfcd   :  { %v1901_v33 = vadd.f32 1.0, %v3964_v32  ;;  %v3966_v34 = vpop.eup %3965 }
 0xfce   :  { %v2074_v35 = vadd.f32 1.0, %v3966_v34 }
 0xfcf   :  { %3967 = vrcp.f32 %v1901_v33 }
 0xfd0   :  { %3969 = vrcp.f32 %v2074_v35 }
 0xfd9   :  { %v3968_v36 = vpop.eup %3967 }
 0xfda   :  { %v3970_v38 = vpop.eup %3969  ;;  %v1905_v42 = vmul.f32 %v3968_v36, %v4445_v57 }
 0xfdb   :  { %v2078_v45 = vmul.f32 %v3970_v38, %v4449_v60 }
0x1036   :  { %v1908_v23 = vpop.permute.xlu1 %1907 }
0x1037   :  { %v1910_v37 = vmul.f32 %v3968_v36, %v1908_v23 }
0x1039   :  { %1912 = vrot.lane.b32.xlu1 %v1910_v37, %s4073_s29 }
0x103e   :  { %v2081_v39 = vpop.permute.xlu0 %2080 }
0x103f   :  { %v2083_v41 = vmul.f32 %v3970_v38, %v2081_v39 }
0x1041   :  { %2085 = vrot.lane.b32.xlu0 %v2083_v41, %s4073_s29 }
0x10ab   :  { %v1913_v43 = vpop.permute.xlu1 %1912 }
0x10ac   :  { %v4493_v40 = vadd.f32 %v1913_v43, %v1905_v42 }
0x10ae   :  { %3971 = vtanh.f32 %v4493_v40 }
0x10b3   :  { %v2086_v46 = vpop.permute.xlu0 %2085 }
0x10b4   :  { %v4497_v47 = vadd.f32 %v2086_v46, %v2078_v45 }
0x10b6   :  { %3973 = vtanh.f32 %v4497_v47 }
0x10b8   :  { %v3972_v50 = vpop.eup %3971 }
0x10b9   :  { %1918 = vrot.lane.b32.xlu1 %v3972_v50, %s4072_s28 }
0x10c0   :  { %v3974_v51 = vpop.eup %3973 }
0x10c1   :  { %2091 = vrot.lane.b32.xlu0 %v3974_v51, %s4072_s28 }
0x112b   :  { %v1919_v53 = vpop.permute.xlu1 %1918 }
0x112c   :  { %v1921_v54 = vmul.f32 %v3968_v36, %v1919_v53 }
0x112e   :  { %1923 = vrot.lane.b32.xlu1 %v1921_v54, %s4073_s29 }
0x1133   :  { %v2092_v55 = vpop.permute.xlu0 %2091 }
0x1134   :  { %v2094_v56 = vmul.f32 %v3970_v38, %v2092_v55 }
0x1136   :  { %2168 = vrot.lane.b32.xlu0 %v2094_v56, %s4073_s29 }
0x11a0   :  { %v1924_v57 = vpop.permute.xlu1 %1923 }
0x11a1   :  { %1926 = vst.msk [vmem:[#allocation3 + $0x8] sm:$0x3] %vm545_vm4, %v1924_v57  ;;  %3565 = vmatmul.mubr.msk.f32.vlgmr.msra.gmra.mrb[22].mxu1 %vm194_vm3, %v1924_v57 }
0x11a2   :  { %3823 = vmatpush3.bf16.msra.mxu1 %v4170_v7  ;;  %3586 = vmatprep.mubr.msk.f32.mxu1 %vm4070_vm2, %v4071_v17 }
0x11a3   :  { %3824 = vmatprep.subr.bf16.mxu1 %v4069_v0 }
0x11a6   :  { %3826 = vmatpush3.bf16.msra.mxu1 %v4186_v13 }
0x11a7   :  { %3833 = vmatprep.subr.bf16.mxu1 %v4069_v0 }
0x11a8   :  { %v2169_v58 = vpop.permute.xlu0 %2168 }
0x11a9   :  { %3576 = vmatmul.mubr.msk.f32.vlgmr.msra.gmra.mrb[24].mxu0 %vm194_vm3, %v2169_v58  ;;  %3587 = vmatmul.mubr.msk.f32.vlgmr.msra.gmra.mrb[24].mxu1 %vm194_vm3, %v2169_v58 }
0x11aa   :  { %3829 = vmatpush3.bf16.msra.mxu0 %v4177_v9  ;;  %3597 = vmatprep.mubr.msk.f32.mxu0 %vm4070_vm2, %v4071_v17 }
0x11ab   :  { %3830 = vmatprep.subr.bf16.mxu0 %v4069_v0  ;;  %3835 = vmatpush3.bf16.msra.mxu1 %v4226_v44 }
0x11ac   :  { %3836 = vmatprep.subr.bf16.mxu1 %v4069_v0  ;;  %3608 = vmatprep.mubr.msk.f32.mxu1 %vm4070_vm2, %v4071_v17 }
0x11ae   :  { %3832 = vmatpush3.bf16.msra.mxu0 %v4194_v16 }
0x11af   :  { %3838 = vmatpush3.bf16.msra.mxu1 %v4237_v49  ;;  %3839 = vmatprep.subr.bf16.mxu0 %v4069_v0 }
0x11b0   :  { %3845 = vmatprep.subr.bf16.mxu1 %v4069_v0 }
0x11b1   :  { %3598 = vmatmul.mubr.msk.f32.vlgmr.msra.gmra.mrb[26].mxu0 %vm194_vm3, %v2342_v59 }
0x11b2   :  { %3841 = vmatpush3.bf16.msra.mxu0 %v4234_v48  ;;  %3619 = vmatprep.mubr.msk.f32.mxu0 %vm4070_vm2, %v4071_v17 }
0x11b3   :  { %3842 = vmatprep.subr.bf16.mxu0 %v4069_v0 }
0x11b6   :  { %3844 = vmatpush3.bf16.msra.mxu0 %v4247_v52 }
0x11b7   :  { %3851 = vmatprep.subr.bf16.mxu0 %v4069_v0 }
0x1274   :  { %v2163_v60 = vpop.f32.mrb[22].mxu1 }
0x1275   :  { %v3566_v62 = vpop.f32.mrb[23].mxu1 }
0x127c   :  { %v2238_v63 = vpop.f32.mrb[24].mxu0  ;;  %v2338_v1 = vpop.f32.mrb[24].mxu1 }
0x127d   :  { %v2239_v2 = vadd.f32 %v2238_v63, %v2163_v60  ;;  %v3577_v3 = vpop.f32.mrb[25].mxu0  ;;  %v3588_v4 = vpop.f32.mrb[25].mxu1 }
0x127f   :  { %v2242_v5 = vadd.f32 %v4292_v61, %v2239_v2 }
0x1281   :  { %3975 = vtanh.f32 %v2242_v5  ;;  %v3124_v15 = vmul.f32 -1.442695, %v2242_v5 }
0x1284   :  { %v2411_v6 = vpop.f32.mrb[26].mxu0 }
0x1285   :  { %v2412_v8 = vadd.f32 %v2411_v6, %v2338_v1  ;;  %v3599_v10 = vpop.f32.mrb[27].mxu0 }
0x1287   :  { %v2415_v11 = vadd.f32 %v4218_v26, %v2412_v8 }
0x1289   :  { %3977 = vtanh.f32 %v2415_v11  ;;  %v3127_v18 = vmul.f32 -1.442695, %v2415_v11 }
0x128a   :  { %3979 = vpow2.f32 %v3124_v15 }
0x128b   :  { %v3976_v12 = vpop.eup %3975  ;;  %3981 = vpow2.f32 %v3127_v18 }
0x128c   :  { %2252 = vrot.lane.b32.xlu1 %v3976_v12, %s4072_s28 }
0x1293   :  { %v3978_v14 = vpop.eup %3977 }
0x1294   :  { %2425 = vrot.lane.b32.xlu0 %v3978_v14, %s4072_s28  ;;  %v3980_v19 = vpop.eup %3979 }
0x1295   :  { %v2246_v20 = vadd.f32 1.0, %v3980_v19  ;;  %v3982_v22 = vpop.eup %3981 }
0x1296   :  { %v2419_v24 = vadd.f32 1.0, %v3982_v22 }
0x1297   :  { %3983 = vrcp.f32 %v2246_v20  ;;  %v2976_v20 = vld [vmem:[#allocation3] sm:$0xff] }
0x1298   :  { %3985 = vrcp.f32 %v2419_v24 }
0x12a1   :  { %v3984_v25 = vpop.eup %3983 }
0x12a2   :  { %v3986_v28 = vpop.eup %3985  ;;  %v2250_v31 = vmul.f32 %v3984_v25, %v4493_v40 }
0x12a3   :  { %v2423_v34 = vmul.f32 %v3986_v28, %v4497_v47 }
0x12fe   :  { %v2253_v27 = vpop.permute.xlu1 %2252 }
0x12ff   :  { %v2255_v26 = vmul.f32 %v3984_v25, %v2253_v27 }
0x1301   :  { %2257 = vrot.lane.b32.xlu1 %v2255_v26, %s4073_s29 }
0x1306   :  { %v2426_v29 = vpop.permute.xlu0 %2425 }
0x1307   :  { %v2428_v30 = vmul.f32 %v3986_v28, %v2426_v29  ;;  %v4016_v29 = vld [vmem:[%s4642_s6 + $0x1] ss:$0 sm:$0xff] }
0x1309   :  { %2430 = vrot.lane.b32.xlu0 %v2428_v30, %s4073_s29 }
0x1373   :  { %v2258_v32 = vpop.permute.xlu1 %2257 }
0x1374   :  { %v4541_v33 = vadd.f32 %v2258_v32, %v2250_v31 }
0x1376   :  { %3987 = vtanh.f32 %v4541_v33 }
0x137b   :  { %v2431_v35 = vpop.permute.xlu0 %2430 }
0x137c   :  { %v4545_v36 = vadd.f32 %v2431_v35, %v2423_v34 }
0x137e   :  { %3989 = vtanh.f32 %v4545_v36 }
0x1380   :  { %v3988_v23 = vpop.eup %3987 }
0x1381   :  { %2263 = vrot.lane.b32.xlu1 %v3988_v23, %s4072_s28 }
0x1388   :  { %v3990_v37 = vpop.eup %3989 }
0x1389   :  { %2436 = vrot.lane.b32.xlu0 %v3990_v37, %s4072_s28 }
0x13f3   :  { %v2264_v38 = vpop.permute.xlu1 %2263 }
0x13f4   :  { %v2266_v39 = vmul.f32 %v3984_v25, %v2264_v38 }
0x13f6   :  { %2268 = vrot.lane.b32.xlu1 %v2266_v39, %s4073_s29 }
0x13fb   :  { %v2437_v41 = vpop.permute.xlu0 %2436 }
0x13fc   :  { %v2439_v42 = vmul.f32 %v3986_v28, %v2437_v41 }
0x13fe   :  { %2513 = vrot.lane.b32.xlu0 %v2439_v42, %s4073_s29  ;;  %v2978_v42 = vld [vmem:[%s4643_s7] sm:$0xff] }
0x1468   :  { %v2269_v43 = vpop.permute.xlu1 %2268 }
0x1469   :  { %2271 = vst.msk [vmem:[#allocation3 + $0xa] sm:$0x3] %vm545_vm4, %v2269_v43  ;;  %3609 = vmatmul.mubr.msk.f32.vlgmr.msra.gmra.mrb[26].mxu1 %vm194_vm3, %v2269_v43  ;;  %v2979_v43 = vld [vmem:[%s4643_s7 + $0x8] sm:$0xff] }
0x146a   :  { %3847 = vmatpush3.bf16.msra.mxu1 %v4170_v7  ;;  %3630 = vmatprep.mubr.msk.f32.mxu1 %vm4070_vm2, %v4071_v17  ;;  %v2687_v7 = vrot.slane %v4207_v21, 6 }
0x146b   :  { %3848 = vmatprep.subr.bf16.mxu1 %v4069_v0 }
0x146e   :  { %3850 = vmatpush3.bf16.msra.mxu1 %v4186_v13 }
0x146f   :  { %3857 = vmatprep.subr.bf16.mxu1 %v4069_v0 }
0x1470   :  { %v2514_v40 = vpop.permute.xlu0 %2513 }
0x1471   :  { %3620 = vmatmul.mubr.msk.f32.vlgmr.msra.gmra.mrb[28].mxu0 %vm194_vm3, %v2514_v40  ;;  %3631 = vmatmul.mubr.msk.f32.vlgmr.msra.gmra.mrb[28].mxu1 %vm194_vm3, %v2514_v40  ;;  %v3869_v40 = vpack.c.bf16 %v2979_v43, %v2978_v42 }
0x1472   :  { %3853 = vmatpush3.bf16.msra.mxu0 %v4177_v9  ;;  %3641 = vmatprep.mubr.msk.f32.mxu0 %vm4070_vm2, %v4071_v17 }
0x1473   :  { %3854 = vmatprep.subr.bf16.mxu0 %v4069_v0  ;;  %3859 = vmatpush3.bf16.msra.mxu1 %v4226_v44 }
0x1474   :  { %3860 = vmatprep.subr.bf16.mxu1 %v4069_v0  ;;  %3652 = vmatprep.mubr.msk.f32.mxu1 %vm4070_vm2, %v4071_v17 }
0x1476   :  { %3856 = vmatpush3.bf16.msra.mxu0 %v4194_v16 }
0x1477   :  { %3862 = vmatpush3.bf16.msra.mxu1 %v4237_v49  ;;  %3863 = vmatprep.subr.bf16.mxu0 %v4069_v0 }
0x1478   :  { %3870 = vmatprep.subr.bf16.mxu1 %v3869_v40 }
0x1479   :  { %3642 = vmatmul.mubr.msk.f32.vlgmr.msra.gmra.mrb[30].mxu0 %vm194_vm3, %v2687_v7  ;;  %v2980_v7 = vld [vmem:[%s4643_s7 + $0x10] sm:$0xff] }
0x147a   :  { %3865 = vmatpush3.bf16.msra.mxu0 %v4234_v48  ;;  %3663 = vmatprep.mubr.msk.f32.mxu0 %vm4070_vm2, %v4071_v17  ;;  %v4015_v17 = vld [vmem:[%s4642_s6] ss:$0 sm:$0xff] }
0x147b   :  { %3866 = vmatprep.subr.bf16.mxu0 %v4069_v0 }
0x147e   :  { %3868 = vmatpush3.bf16.msra.mxu0 %v4247_v52 }
0x153c   :  { %v2508_v9 = vpop.f32.mrb[26].mxu1 }
0x153d   :  { %v3610_v13 = vpop.f32.mrb[27].mxu1 }
0x1544   :  { %v2583_v16 = vpop.f32.mrb[28].mxu0  ;;  %v2683_v44 = vpop.f32.mrb[28].mxu1 }
0x1545   :  { %v2584_v21 = vadd.f32 %v2583_v16, %v2508_v9  ;;  %v3621_v45 = vpop.f32.mrb[29].mxu0  ;;  %v3632_v49 = vpop.f32.mrb[29].mxu1  ;;  %v2981_v9 = vld [vmem:[%s4643_s7 + $0x18] sm:$0xff] }
0x1546   :  { %v3873_v13 = vpack.c.bf16 %v2981_v9, %v2980_v7 }
0x1547   :  { %v2587_v46 = vadd.f32 %v4292_v61, %v2584_v21 }
0x1549   :  { %3991 = vtanh.f32 %v2587_v46  ;;  %v3130_v53 = vmul.f32 -1.442695, %v2587_v46 }
0x154c   :  { %v2756_v47 = vpop.f32.mrb[30].mxu0 }
0x154d   :  { %v2757_v50 = vadd.f32 %v2756_v47, %v2683_v44  ;;  %v3643_v48 = vpop.f32.mrb[31].mxu0 }
0x154f   :  { %v2760_v0 = vadd.f32 %v4015_v17, %v2757_v50  ;;  %v3137_v17 = vld [vmem:[%s4644_s8] ss:$0 sm:$0xff] }
0x1551   :  { %3993 = vtanh.f32 %v2760_v0  ;;  %v3133_v54 = vmul.f32 -1.442695, %v2760_v0 }
0x1552   :  { %3995 = vpow2.f32 %v3130_v53 }
0x1553   :  { %v3992_v52 = vpop.eup %3991  ;;  %3997 = vpow2.f32 %v3133_v54 }
0x1554   :  { %2597 = vrot.lane.b32.xlu1 %v3992_v52, %s4072_s28 }
0x155b   :  { %v3994_v51 = vpop.eup %3993 }
0x155c   :  { %2770 = vrot.lane.b32.xlu0 %v3994_v51, %s4072_s28  ;;  %v3996_v61 = vpop.eup %3995 }
0x155d   :  { %v2591_v55 = vadd.f32 1.0, %v3996_v61  ;;  %v3998_v56 = vpop.eup %3997 }
0x155e   :  { %v2764_v57 = vadd.f32 1.0, %v3998_v56 }
0x155f   :  { %3999 = vrcp.f32 %v2591_v55 }
0x1560   :  { %4001 = vrcp.f32 %v2764_v57 }
0x1569   :  { %v4000_v58 = vpop.eup %3999 }
0x156a   :  { %v4002_v62 = vpop.eup %4001  ;;  %v2595_v2 = vmul.f32 %v4000_v58, %v4541_v33 }
0x156b   :  { %v2768_v5 = vmul.f32 %v4002_v62, %v4545_v36 }
0x15c6   :  { %v2598_v59 = vpop.permute.xlu1 %2597 }
0x15c7   :  { %v2600_v60 = vmul.f32 %v4000_v58, %v2598_v59 }
0x15c9   :  { %2602 = vrot.lane.b32.xlu1 %v2600_v60, %s4073_s29 }
0x15ce   :  { %v2771_v63 = vpop.permute.xlu0 %2770 }
0x15cf   :  { %v2773_v1 = vmul.f32 %v4002_v62, %v2771_v63 }
0x15d1   :  { %2775 = vrot.lane.b32.xlu0 %v2773_v1, %s4073_s29 }
0x163b   :  { %v2603_v3 = vpop.permute.xlu1 %2602 }
0x163c   :  { %v2605_v4 = vadd.f32 %v2603_v3, %v2595_v2 }
0x163e   :  { %4003 = vtanh.f32 %v2605_v4 }
0x1643   :  { %v2776_v6 = vpop.permute.xlu0 %2775 }
0x1644   :  { %v4590_v8 = vadd.f32 %v2776_v6, %v2768_v5 }
0x1646   :  { %4005 = vtanh.f32 %v4590_v8 }
0x1648   :  { %v4004_v10 = vpop.eup %4003 }
0x1649   :  { %2608 = vrot.lane.b32.xlu1 %v4004_v10, %s4072_s28 }
0x1650   :  { %v4006_v11 = vpop.eup %4005 }
0x1651   :  { %2781 = vrot.lane.b32.xlu0 %v4006_v11, %s4072_s28 }
0x16bb   :  { %v2609_v12 = vpop.permute.xlu1 %2608 }
0x16bc   :  { %v2611_v14 = vmul.f32 %v4000_v58, %v2609_v12 }
0x16be   :  { %2613 = vrot.lane.b32.xlu1 %v2611_v14, %s4073_s29 }
0x16c3   :  { %v2782_v15 = vpop.permute.xlu0 %2781 }
0x16c4   :  { %v2784_v18 = vmul.f32 %v4002_v62, %v2782_v15 }
0x16c6   :  { %2858 = vrot.lane.b32.xlu0 %v2784_v18, %s4073_s29 }
0x1730   :  { %v2614_v19 = vpop.permute.xlu1 %2613 }
0x1731   :  { %2616 = vst.msk [vmem:[#allocation3 + $0xc] sm:$0x3] %vm545_vm4, %v2614_v19  ;;  %3653 = vmatmul.mubr.msk.f32.vlgmr.msra.gmra.mrb[30].mxu1 %vm194_vm3, %v2614_v19 }
0x1732   :  { %3674 = vmatprep.mubr.msk.f32.mxu1 %vm194_vm3, %v2976_v20  ;;  %3872 = vmatpush3.bf16.msra.mxu1 %v3869_v40 }
0x1733   :  { %3874 = vmatprep.subr.bf16.mxu1 %v3873_v13 }
0x1736   :  { %3876 = vmatpush3.bf16.msra.mxu1 %v3873_v13 }
0x1738   :  { %v2859_v22 = vpop.permute.xlu0 %2858 }
0x1739   :  { %3664 = vmatmul.mubr.msk.f32.vlgmr.msra.gmra.mrb[32].mxu0 %vm194_vm3, %v2859_v22  ;;  %v2970_v49 = vsel %vm194_vm3, %v2859_v22, %v4590_v8 }
0x1804   :  { %v2853_v24 = vpop.f32.mrb[30].mxu1 }
0x1805   :  { %v3654_v25 = vpop.f32.mrb[31].mxu1 }
0x180c   :  { %v2928_v27 = vpop.f32.mrb[32].mxu0 }
0x180d   :  { %v2929_v26 = vadd.f32 %v2928_v27, %v2853_v24  ;;  %v3665_v28 = vpop.f32.mrb[33].mxu0 }
0x180f   :  { %v2932_v30 = vadd.f32 %v4016_v29, %v2929_v26 }
0x1811   :  { %4007 = vtanh.f32 %v2932_v30  ;;  %v3136_v32 = vmul.f32 -1.442695, %v2932_v30 }
0x1813   :  { %4009 = vpow2.f32 %v3136_v32 }
0x181b   :  { %v4008_v31 = vpop.eup %4007 }
0x181c   :  { %2942 = vrot.lane.b32.xlu1 %v4008_v31, %s4072_s28 }
0x181d   :  { %v4010_v33 = vpop.eup %4009 }
0x181e   :  { %v2936_v34 = vadd.f32 1.0, %v4010_v33 }
0x1820   :  { %4011 = vrcp.f32 %v2936_v34 }
0x182a   :  { %v4012_v35 = vpop.eup %4011 }
0x182b   :  { %v2940_v37 = vmul.f32 %v4012_v35, %v2605_v4 }
0x188e   :  { %v2943_v36 = vpop.permute.xlu1 %2942 }
0x188f   :  { %v2945_v23 = vmul.f32 %v4012_v35, %v2943_v36 }
0x1891   :  { %2947 = vrot.lane.b32.xlu0 %v2945_v23, %s4073_s29 }
0x1903   :  { %v2948_v38 = vpop.permute.xlu0 %2947 }
0x1904   :  { %v2950_v39 = vadd.f32 %v2948_v38, %v2940_v37 }
0x1906   :  { %4013 = vtanh.f32 %v2950_v39 }
0x1910   :  { %v4014_v41 = vpop.eup %4013 }
0x1911   :  { %2953 = vrot.lane.b32.xlu1 %v4014_v41, %s4072_s28 }
0x1983   :  { %v2954_v16 = vpop.permute.xlu1 %2953 }
0x1984   :  { %v2956_v44 = vmul.f32 %v4012_v35, %v2954_v16 }
0x1986   :  { %2963 = vrot.lane.b32.xlu1 %v2956_v44, %s4074_s25  ;;  %2958 = vrot.lane.b32.xlu0 %v2956_v44, %s4073_s29 }
0x198a   :  { %2967 = vrot.lane.b32.xlu0 %v2950_v39, %s4072_s28 }
0x19f8   :  { %v2959_v21 = vpop.permute.xlu0 %2958  ;;  %v2964_v45 = vpop.permute.xlu1 %2963 }
0x19f9   :  { %2961 = vst.msk [vmem:[#allocation3 + $0xe] sm:$0x3] %vm545_vm4, %v2959_v21  ;;  %v2972_v46 = vsel %vm2971_vm5, %v2970_v49, %v2964_v45 }
0x19fc   :  { %v2968_v47 = vpop.permute.xlu0 %2967 }
0x19fd   :  { %v2974_v50 = vsel %vm2973_vm6, %v2972_v46, %v2968_v47 }
0x19fe   :  { %2975 = vst [vmem:[#allocation2] sm:$0x3] %v2974_v50 }
0x1a00   :  { %v2977_v48 = vld [vmem:[#allocation3 + $0x8] sm:$0xff] }
0x1a01   :  { %3675 = vmatmul.mubr.msk.f32.vlgmr.msra.gmra.mrb[32].mxu1 %vm194_vm3, %v2977_v48 }
0x1ad4   :  { %v3676_v0 = vpop.f32.mrb[32].mxu1 }
0x1ad5   :  { %v3067_v52 = vadd.f32 %v3676_v0, %v3137_v17  ;;  %v3061_v51 = vpop.f32.mrb[33].mxu1 }
0x1ad6   :  { %v3062_v53 = vadd.f32 %v3137_v17, %v3061_v51 }
0x1ad7   :  { %3071 = vst.msk [vmem:[%s4645_s9 + $0x8] sm:$0xff] %vm74_vm1, %v3067_v52 }
0x1ad8   :  { %3070 = vst.msk [vmem:[%s4645_s9] sm:$0xff] %vm74_vm1, %v3062_v53 }
0x1ad9   :  { %3076 = vsyncpa [#allocation5], 1 }
0x1ada   :  { %3077 = vsyncpa [#allocation7], 1 }

</bundles_post_ra>
